<compile_context>
chip_gen: v5e
topology: v5e:2x2
jax: 0.10.0
libtpu: 0.0.40
codegen_flags: <defaults>
</compile_context>

<pallas_src>
import jax
import jax.numpy as jnp
from jax.experimental import pallas as pl
from jax.experimental.pallas import tpu as pltpu


_LANE = 128
_SUBLANE = 8


def _round_up(n, m):
    return ((n + m - 1) // m) * m


# ---------------------------------------------------------------------------
# Fused kernel: encode -> reparameterize -> decode -> packed slab stores
# ---------------------------------------------------------------------------
def _vae_fused_kernel(x_ref, eps_ref,
                      w1_ref, b1_ref,        # encoder trunk   [D, H], [1, H]
                      wz_ref, bz_ref,        # encoder heads   [H, 2Z] (loc | log_var)
                      w2_ref, b2_ref,        # decoder trunk   [Z, H], [1, H]
                      wx_ref, bx_ref,        # decoder heads   [H, 2D] (loc | log_scale)
                      xslab_ref, zslab_ref): # outputs: (Tb, >=2D), (Tb, >=3Z)
    f32, bf16 = jnp.float32, jnp.bfloat16
    D = x_ref.shape[-1]
    Z = eps_ref.shape[-1]

    # ------------------ encoder ------------------
    x = x_ref[...].astype(bf16)                                         # [Tb, D]
    h = jnp.dot(x, w1_ref[...], preferred_element_type=f32) + b1_ref[...]
    h = jnp.maximum(h, 0.0)                                             # ReLU (f32)

    # fused two-head matmul: [Tb, H] @ [H, 2Z] -> (z_loc | z_log_var)
    hz = jnp.dot(h.astype(bf16), wz_ref[...],
                 preferred_element_type=f32) + bz_ref[...]
    z_loc, z_log_var = hz[:, :Z], hz[:, Z:]

    # ----------- reparameterization (f32) --------
    z_scale = jnp.exp(0.5 * z_log_var)
    z = z_loc + z_scale * eps_ref[...]                                  # rsample()

    # ------------------ decoder ------------------
    hd = jnp.dot(z.astype(bf16), w2_ref[...],
                 preferred_element_type=f32) + b2_ref[...]
    hd = jnp.maximum(hd, 0.0)

    # fused two-head matmul: [Tb, H] @ [H, 2D] -> (x_loc | x_log_scale)
    hx = jnp.dot(hd.astype(bf16), wx_ref[...],
                 preferred_element_type=f32) + bx_ref[...]
    x_loc, x_log_scale = hx[:, :D], hx[:, D:]
    x_scale = jnp.exp(x_log_scale)

    # -------- packed, lane-dense slab stores ------
    def pack(parts, ref):
        pad = ref.shape[-1] - sum(p.shape[-1] for p in parts)   # static int
        if pad:
            parts = parts + [jnp.zeros((parts[0].shape[0], pad), f32)]
        ref[...] = jnp.concatenate(parts, axis=-1).astype(ref.dtype)

    pack([x_loc, x_scale], xslab_ref)         # 1 dense store instead of 2 masked
    pack([z, z_loc, z_scale], zslab_ref)      # 1 dense store instead of 3 masked


# ---------------------------------------------------------------------------
# Host-side helper: head fusion / dtype packing (done once, outside hot path)
# ---------------------------------------------------------------------------
def pack_params(params):
    """Fuse the two head matrices per stage into one [_, 2*out] matmul and cast
    matmul weights to bf16 (biases stay f32 for the f32 elementwise tail).
    NOTE: bf16 weights are the intended MXU contract here (matches reference)."""
    bf16, f32 = jnp.bfloat16, jnp.float32
    return {
        "w1": params["w1"].astype(bf16),
        "b1": params["b1"].astype(f32),
        "wz": jnp.concatenate([params["w_loc"], params["w_lv"]], axis=1).astype(bf16),
        "bz": jnp.concatenate([params["b_loc"], params["b_lv"]], axis=1).astype(f32),
        "w2": params["w2"].astype(bf16),
        "b2": params["b2"].astype(f32),
        "wx": jnp.concatenate([params["w_xloc"], params["w_xls"]], axis=1).astype(bf16),
        "bx": jnp.concatenate([params["b_xloc"], params["b_xls"]], axis=1).astype(f32),
    }


# ---------------------------------------------------------------------------
# Forward wrapper (single fused pallas_call over a batch grid)
# ---------------------------------------------------------------------------
def vae_forward(batch, eps, packed, *, tile_b=None, out_dtype=jnp.bfloat16):
    """Mirror of VAE.forward: returns (x_loc, x_scale, z, z_loc, z_scale)."""
    x, _ = batch
    B, D = x.shape
    Z = eps.shape[-1]

    x = x.astype(jnp.float32)
    eps = eps.astype(jnp.float32)

    # ---- batch tiling (the only axis that may be padded) --------------------
    if tile_b is None:
        # Small batch: one big block (no per-step overhead, fills the 256-wide
        # MXU on v6e/v7x).  Large batch: 512-row tiles, >=2 "parallel" grid
        # steps so v7x's two TensorCores both get work.
        tile_b = _round_up(B, _SUBLANE) if B <= 1024 else 512
    tile_b = _round_up(tile_b, _SUBLANE)
    Bp = _round_up(B, tile_b)
    if Bp != B:                                   # only when B is not a tile multiple
        x = jnp.pad(x, ((0, Bp - B), (0, 0)))
        eps = jnp.pad(eps, ((0, Bp - B), (0, 0)))
    grid = (Bp // tile_b,)

    # ---- packed, lane-dense output slab widths ------------------------------
    xw = _round_up(2 * D, _LANE)                  # (x_loc | x_scale | 0-pad)
    zw = _round_up(3 * Z, _LANE)                  # (z | z_loc | z_scale | 0-pad)

    def act_spec(feat):                           # one batch block per grid step
        return pl.BlockSpec((tile_b, feat), lambda i: (i, 0))

    def resident_spec(a):                         # constant block -> VMEM-resident,
        return pl.BlockSpec(a.shape, lambda i: (0, 0),   # single-buffered
                            pipeline_mode=pl.Buffered(1))

    in_specs = [
        act_spec(D),                              # x
        act_spec(Z),                              # eps
        resident_spec(packed["w1"]), resident_spec(packed["b1"]),
        resident_spec(packed["wz"]), resident_spec(packed["bz"]),
        resident_spec(packed["w2"]), resident_spec(packed["b2"]),
        resident_spec(packed["wx"]), resident_spec(packed["bx"]),
    ]
    out_specs = (act_spec(xw), act_spec(zw))
    out_shape = (jax.ShapeDtypeStruct((Bp, xw), out_dtype),
                 jax.ShapeDtypeStruct((Bp, zw), out_dtype))

    x_slab, z_slab = pl.pallas_call(
        _vae_fused_kernel,
        grid=grid,
        in_specs=in_specs,
        out_specs=out_specs,
        out_shape=out_shape,
        compiler_params=pltpu.CompilerParams(
            dimension_semantics=("parallel",)),   # megacore-shardable batch axis
    )(x, eps,
      packed["w1"], packed["b1"], packed["wz"], packed["bz"],
      packed["w2"], packed["b2"], packed["wx"], packed["bx"])

    # Single split of the packed slabs (the only wrapper-side copies; a fused
    # loss could take x_slab / z_slab directly and skip these).
    return (x_slab[:B, 0:D], x_slab[:B, D:2 * D],
            z_slab[:B, 0:Z], z_slab[:B, Z:2 * Z], z_slab[:B, 2 * Z:3 * Z])


# ---------------------------------------------------------------------------
# Deterministic parameter init (synthetic MLP encoder/decoder weights)
# ---------------------------------------------------------------------------
def init_params(key, data_dim, hidden_dim, z_dim):
    keys = jax.random.split(key, 6)
    s = 0.1
    return {
        # encoder: Linear(D,H) -> ReLU -> heads Linear(H,Z) x2
        "w1":     s * jax.random.normal(keys[0], (data_dim, hidden_dim), jnp.float32),
        "b1":     jnp.zeros((1, hidden_dim), jnp.float32),
        "w_loc":  s * jax.random.normal(keys[1], (hidden_dim, z_dim), jnp.float32),
        "b_loc":  jnp.zeros((1, z_dim), jnp.float32),
        "w_lv":   s * jax.random.normal(keys[2], (hidden_dim, z_dim), jnp.float32),
        "b_lv":   jnp.zeros((1, z_dim), jnp.float32),
        # decoder: Linear(Z,H) -> ReLU -> heads Linear(H,D) x2
        "w2":     s * jax.random.normal(keys[3], (z_dim, hidden_dim), jnp.float32),
        "b2":     jnp.zeros((1, hidden_dim), jnp.float32),
        "w_xloc": s * jax.random.normal(keys[4], (hidden_dim, data_dim), jnp.float32),
        "b_xloc": jnp.zeros((1, data_dim), jnp.float32),
        "w_xls":  s * jax.random.normal(keys[5], (hidden_dim, data_dim), jnp.float32),
        "b_xls":  jnp.zeros((1, data_dim), jnp.float32),
    }


# Pure-JAX reference (same bf16-matmul / f32-elementwise recipe) for validation.
def reference_forward(x, eps, params):
    bf16, f32 = jnp.bfloat16, jnp.float32

    def mm(a, w):
        return jnp.dot(a.astype(bf16), w.astype(bf16), preferred_element_type=f32)

    h = jnp.maximum(mm(x, params["w1"]) + params["b1"], 0.0)
    z_loc = mm(h, params["w_loc"]) + params["b_loc"]
    z_log_var = mm(h, params["w_lv"]) + params["b_lv"]
    z_scale = jnp.exp(0.5 * z_log_var)
    z = z_loc + z_scale * eps
    hd = jnp.maximum(mm(z, params["w2"]) + params["b2"], 0.0)
    x_loc = mm(hd, params["w_xloc"]) + params["b_xloc"]
    x_scale = jnp.exp(mm(hd, params["w_xls"]) + params["b_xls"])
    return x_loc, x_scale, z, z_loc, z_scale


if __name__ == "__main__":
    B, D, H, Z = 256, 64, 32, 16   # batch, data dim, hidden dim, latent dim

    key = jax.random.PRNGKey(0)
    k_x, k_eps, k_params = jax.random.split(key, 3)

    x = jax.random.normal(k_x, (B, D), jnp.float32)
    y = jnp.zeros((B,), jnp.float32)                        # unused batch element
    eps = jax.random.normal(k_eps, (B, Z), jnp.float32)     # rsample noise
    # TODO(synk): eps could be drawn in-kernel (pltpu.prng_seed +
    # pltpu.stateful_normal seeded per program_id) to drop one input DMA
    # stream; kept as an explicit input for determinism / validation.

    params = init_params(k_params, D, H, Z)
    packed = pack_params(params)

    fwd = jax.jit(vae_forward, static_argnames=("tile_b", "out_dtype"))
    outs = fwd((x, y), eps, packed)
    outs = jax.block_until_ready(outs)

    x_loc, x_scale, z, z_loc, z_scale = outs
    assert x_loc.shape == (B, D) and x_scale.shape == (B, D)
    assert z.shape == (B, Z) and z_loc.shape == (B, Z) and z_scale.shape == (B, Z)
    assert bool(jnp.all(x_scale > 0)) and bool(jnp.all(z_scale > 0))

    # numerical check against the pure-JAX reference (same precision recipe;
    # kernel outputs are bf16, so compare in f32 with bf16-level tolerance)
    refs = reference_forward(x, eps, params)
    for got, ref in zip(outs, refs):
        got32 = got.astype(jnp.float32)
        assert bool(jnp.allclose(got32, ref, atol=2e-2, rtol=2e-2)), (
            float(jnp.max(jnp.abs(got32 - ref))))

    print("KERNEL_OK")
</pallas_src>

<mosaic_0001>
module attributes {stable_mosaic.version = 11 : i64} {
  func.func @_vae_fused_kernel(%arg0: i32, %arg1: memref<256x64xf32, #tpu.memory_space<vmem>>, %arg2: memref<256x16xf32, #tpu.memory_space<vmem>>, %arg3: memref<64x32xbf16, #tpu.memory_space<vmem>>, %arg4: memref<1x32xf32, #tpu.memory_space<vmem>>, %arg5: memref<32x32xbf16, #tpu.memory_space<vmem>>, %arg6: memref<1x32xf32, #tpu.memory_space<vmem>>, %arg7: memref<16x32xbf16, #tpu.memory_space<vmem>>, %arg8: memref<1x32xf32, #tpu.memory_space<vmem>>, %arg9: memref<32x128xbf16, #tpu.memory_space<vmem>>, %arg10: memref<1x128xf32, #tpu.memory_space<vmem>>, %arg11: memref<256x128xbf16, #tpu.memory_space<vmem>>, %arg12: memref<256x128xbf16, #tpu.memory_space<vmem>>) attributes {dimension_semantics = [#tpu.dimension_semantics<parallel>], iteration_bounds = array<i64: 1>, scalar_prefetch = 0 : i64, scratch_operands = 0 : i64, tpu.core_type = #tpu.core_type<tc>, window_params = [{transform_indices = @transform_0, window_bounds = array<i64: 256, 64>}, {transform_indices = @transform_1, window_bounds = array<i64: 256, 16>}, {pipeline_mode = #tpu.pipeline_mode<synchronous>, transform_indices = @transform_2, window_bounds = array<i64: 64, 32>}, {pipeline_mode = #tpu.pipeline_mode<synchronous>, transform_indices = @transform_3, window_bounds = array<i64: 1, 32>}, {pipeline_mode = #tpu.pipeline_mode<synchronous>, transform_indices = @transform_4, window_bounds = array<i64: 32, 32>}, {pipeline_mode = #tpu.pipeline_mode<synchronous>, transform_indices = @transform_5, window_bounds = array<i64: 1, 32>}, {pipeline_mode = #tpu.pipeline_mode<synchronous>, transform_indices = @transform_6, window_bounds = array<i64: 16, 32>}, {pipeline_mode = #tpu.pipeline_mode<synchronous>, transform_indices = @transform_7, window_bounds = array<i64: 1, 32>}, {pipeline_mode = #tpu.pipeline_mode<synchronous>, transform_indices = @transform_8, window_bounds = array<i64: 32, 128>}, {pipeline_mode = #tpu.pipeline_mode<synchronous>, transform_indices = @transform_9, window_bounds = array<i64: 1, 128>}, {transform_indices = @transform_10, window_bounds = array<i64: 256, 128>}, {transform_indices = @transform_11, window_bounds = array<i64: 256, 128>}]} {
    %c0 = arith.constant 0 : index
    %c0_0 = arith.constant 0 : index
    %0 = vector.load %arg1[%c0, %c0_0] : memref<256x64xf32, #tpu.memory_space<vmem>>, vector<256x64xf32>
    %1 = arith.truncf %0 : vector<256x64xf32> to vector<256x64xbf16>
    %c0_1 = arith.constant 0 : index
    %c0_2 = arith.constant 0 : index
    %2 = vector.load %arg3[%c0_1, %c0_2] : memref<64x32xbf16, #tpu.memory_space<vmem>>, vector<64x32xbf16>
    %cst = arith.constant dense<0.000000e+00> : vector<256x32xf32>
    %3 = tpu.matmul %1, %2, %cst {dimension_numbers = #tpu.dot_dimension_numbers<[1], [0], [0], [1], [0, 0, 1, 1], [], []>} : vector<256x64xbf16>, vector<64x32xbf16>, vector<256x32xf32> -> vector<256x32xf32>
    %c0_3 = arith.constant 0 : index
    %c0_4 = arith.constant 0 : index
    %4 = vector.load %arg4[%c0_3, %c0_4] : memref<1x32xf32, #tpu.memory_space<vmem>>, vector<1x32xf32>
    %5 = vector.broadcast %4 : vector<1x32xf32> to vector<256x32xf32>
    %6 = arith.addf %3, %5 : vector<256x32xf32>
    %cst_5 = arith.constant 0.000000e+00 : f32
    %7 = vector.broadcast %cst_5 : f32 to vector<256x32xf32>
    %8 = arith.maximumf %6, %7 : vector<256x32xf32>
    %9 = arith.truncf %8 : vector<256x32xf32> to vector<256x32xbf16>
    %c0_6 = arith.constant 0 : index
    %c0_7 = arith.constant 0 : index
    %10 = vector.load %arg5[%c0_6, %c0_7] : memref<32x32xbf16, #tpu.memory_space<vmem>>, vector<32x32xbf16>
    %cst_8 = arith.constant dense<0.000000e+00> : vector<256x32xf32>
    %11 = tpu.matmul %9, %10, %cst_8 {dimension_numbers = #tpu.dot_dimension_numbers<[1], [0], [0], [1], [0, 0, 1, 1], [], []>} : vector<256x32xbf16>, vector<32x32xbf16>, vector<256x32xf32> -> vector<256x32xf32>
    %c0_9 = arith.constant 0 : index
    %c0_10 = arith.constant 0 : index
    %12 = vector.load %arg6[%c0_9, %c0_10] : memref<1x32xf32, #tpu.memory_space<vmem>>, vector<1x32xf32>
    %13 = vector.broadcast %12 : vector<1x32xf32> to vector<256x32xf32>
    %14 = arith.addf %11, %13 : vector<256x32xf32>
    %15 = vector.extract_strided_slice %14 {offsets = [0, 0], sizes = [256, 16], strides = [1, 1]} : vector<256x32xf32> to vector<256x16xf32>
    %16 = vector.extract_strided_slice %14 {offsets = [0, 16], sizes = [256, 16], strides = [1, 1]} : vector<256x32xf32> to vector<256x16xf32>
    %cst_11 = arith.constant 5.000000e-01 : f32
    %17 = vector.broadcast %cst_11 : f32 to vector<256x16xf32>
    %18 = arith.mulf %17, %16 : vector<256x16xf32>
    %19 = math.exp %18 : vector<256x16xf32>
    %c0_12 = arith.constant 0 : index
    %c0_13 = arith.constant 0 : index
    %20 = vector.load %arg2[%c0_12, %c0_13] : memref<256x16xf32, #tpu.memory_space<vmem>>, vector<256x16xf32>
    %21 = arith.mulf %19, %20 : vector<256x16xf32>
    %22 = arith.addf %15, %21 : vector<256x16xf32>
    %23 = arith.truncf %22 : vector<256x16xf32> to vector<256x16xbf16>
    %c0_14 = arith.constant 0 : index
    %c0_15 = arith.constant 0 : index
    %24 = vector.load %arg7[%c0_14, %c0_15] : memref<16x32xbf16, #tpu.memory_space<vmem>>, vector<16x32xbf16>
    %cst_16 = arith.constant dense<0.000000e+00> : vector<256x32xf32>
    %25 = tpu.matmul %23, %24, %cst_16 {dimension_numbers = #tpu.dot_dimension_numbers<[1], [0], [0], [1], [0, 0, 1, 1], [], []>} : vector<256x16xbf16>, vector<16x32xbf16>, vector<256x32xf32> -> vector<256x32xf32>
    %c0_17 = arith.constant 0 : index
    %c0_18 = arith.constant 0 : index
    %26 = vector.load %arg8[%c0_17, %c0_18] : memref<1x32xf32, #tpu.memory_space<vmem>>, vector<1x32xf32>
    %27 = vector.broadcast %26 : vector<1x32xf32> to vector<256x32xf32>
    %28 = arith.addf %25, %27 : vector<256x32xf32>
    %cst_19 = arith.constant 0.000000e+00 : f32
    %29 = vector.broadcast %cst_19 : f32 to vector<256x32xf32>
    %30 = arith.maximumf %28, %29 : vector<256x32xf32>
    %31 = arith.truncf %30 : vector<256x32xf32> to vector<256x32xbf16>
    %c0_20 = arith.constant 0 : index
    %c0_21 = arith.constant 0 : index
    %32 = vector.load %arg9[%c0_20, %c0_21] : memref<32x128xbf16, #tpu.memory_space<vmem>>, vector<32x128xbf16>
    %cst_22 = arith.constant dense<0.000000e+00> : vector<256x128xf32>
    %33 = tpu.matmul %31, %32, %cst_22 {dimension_numbers = #tpu.dot_dimension_numbers<[1], [0], [0], [1], [0, 0, 1, 1], [], []>} : vector<256x32xbf16>, vector<32x128xbf16>, vector<256x128xf32> -> vector<256x128xf32>
    %c0_23 = arith.constant 0 : index
    %c0_24 = arith.constant 0 : index
    %34 = vector.load %arg10[%c0_23, %c0_24] : memref<1x128xf32, #tpu.memory_space<vmem>>, vector<1x128xf32>
    %35 = vector.broadcast %34 : vector<1x128xf32> to vector<256x128xf32>
    %36 = arith.addf %33, %35 : vector<256x128xf32>
    %37 = vector.extract_strided_slice %36 {offsets = [0, 0], sizes = [256, 64], strides = [1, 1]} : vector<256x128xf32> to vector<256x64xf32>
    %38 = vector.extract_strided_slice %36 {offsets = [0, 64], sizes = [256, 64], strides = [1, 1]} : vector<256x128xf32> to vector<256x64xf32>
    %39 = math.exp %38 : vector<256x64xf32>
    %40 = tpu.concatenate %37, %39 in 1 : vector<256x64xf32>, vector<256x64xf32> -> vector<256x128xf32>
    %41 = arith.truncf %40 : vector<256x128xf32> to vector<256x128xbf16>
    %c0_25 = arith.constant 0 : index
    %c0_26 = arith.constant 0 : index
    %42 = vector.load %arg11[%c0_25, %c0_26] : memref<256x128xbf16, #tpu.memory_space<vmem>>, vector<256x128xbf16>
    tpu.vector_store %arg11[%c0_25, %c0_26], %41 {strides = array<i32>} : memref<256x128xbf16, #tpu.memory_space<vmem>>, vector<256x128xbf16>,
    %cst_27 = arith.constant 0.000000e+00 : f32
    %43 = vector.broadcast %cst_27 : f32 to vector<256x80xf32>
    %44 = tpu.concatenate %22, %15, %19, %43 in 1 : vector<256x16xf32>, vector<256x16xf32>, vector<256x16xf32>, vector<256x80xf32> -> vector<256x128xf32>
    %45 = arith.truncf %44 : vector<256x128xf32> to vector<256x128xbf16>
    %c0_28 = arith.constant 0 : index
    %c0_29 = arith.constant 0 : index
    %46 = vector.load %arg12[%c0_28, %c0_29] : memref<256x128xbf16, #tpu.memory_space<vmem>>, vector<256x128xbf16>
    tpu.vector_store %arg12[%c0_28, %c0_29], %45 {strides = array<i32>} : memref<256x128xbf16, #tpu.memory_space<vmem>>, vector<256x128xbf16>,
    return
  }
  func.func @transform_0(%arg0: i32) -> (i32, i32) {
    %c0_i32 = arith.constant 0 : i32
    %c0_i32_0 = arith.constant 0 : i32
    return %arg0, %c0_i32 : i32, i32
  }
  func.func @transform_1(%arg0: i32) -> (i32, i32) {
    %c0_i32 = arith.constant 0 : i32
    %c0_i32_0 = arith.constant 0 : i32
    return %arg0, %c0_i32 : i32, i32
  }
  func.func @transform_2(%arg0: i32) -> (i32, i32) {
    %c0_i32 = arith.constant 0 : i32
    %c0_i32_0 = arith.constant 0 : i32
    %c0_i32_1 = arith.constant 0 : i32
    return %c0_i32, %c0_i32_0 : i32, i32
  }
  func.func @transform_3(%arg0: i32) -> (i32, i32) {
    %c0_i32 = arith.constant 0 : i32
    %c0_i32_0 = arith.constant 0 : i32
    %c0_i32_1 = arith.constant 0 : i32
    return %c0_i32, %c0_i32_0 : i32, i32
  }
  func.func @transform_4(%arg0: i32) -> (i32, i32) {
    %c0_i32 = arith.constant 0 : i32
    %c0_i32_0 = arith.constant 0 : i32
    %c0_i32_1 = arith.constant 0 : i32
    return %c0_i32, %c0_i32_0 : i32, i32
  }
  func.func @transform_5(%arg0: i32) -> (i32, i32) {
    %c0_i32 = arith.constant 0 : i32
    %c0_i32_0 = arith.constant 0 : i32
    %c0_i32_1 = arith.constant 0 : i32
    return %c0_i32, %c0_i32_0 : i32, i32
  }
  func.func @transform_6(%arg0: i32) -> (i32, i32) {
    %c0_i32 = arith.constant 0 : i32
    %c0_i32_0 = arith.constant 0 : i32
    %c0_i32_1 = arith.constant 0 : i32
    return %c0_i32, %c0_i32_0 : i32, i32
  }
  func.func @transform_7(%arg0: i32) -> (i32, i32) {
    %c0_i32 = arith.constant 0 : i32
    %c0_i32_0 = arith.constant 0 : i32
    %c0_i32_1 = arith.constant 0 : i32
    return %c0_i32, %c0_i32_0 : i32, i32
  }
  func.func @transform_8(%arg0: i32) -> (i32, i32) {
    %c0_i32 = arith.constant 0 : i32
    %c0_i32_0 = arith.constant 0 : i32
    %c0_i32_1 = arith.constant 0 : i32
    return %c0_i32, %c0_i32_0 : i32, i32
  }
  func.func @transform_9(%arg0: i32) -> (i32, i32) {
    %c0_i32 = arith.constant 0 : i32
    %c0_i32_0 = arith.constant 0 : i32
    %c0_i32_1 = arith.constant 0 : i32
    return %c0_i32, %c0_i32_0 : i32, i32
  }
  func.func @transform_10(%arg0: i32) -> (i32, i32) {
    %c0_i32 = arith.constant 0 : i32
    %c0_i32_0 = arith.constant 0 : i32
    return %arg0, %c0_i32 : i32, i32
  }
  func.func @transform_11(%arg0: i32) -> (i32, i32) {
    %c0_i32 = arith.constant 0 : i32
    %c0_i32_0 = arith.constant 0 : i32
    return %arg0, %c0_i32 : i32, i32
  }
}

</mosaic_0001>

<bundles_post_ra>
// kernel: vae_forward.1
= control target key start
LH: loop header
LB: loop body
LE: loop exit
PB: predicated region body
PF: predicated region fallthrough
CT: control target
= control target key end

     0   :  { %vm122_vm0 = vcmask 523264   ;;  %s2466_s20 = smov 16   ;;  %vm328_vm1 = vcmask 261120   ;;  %vm942_vm2 = vcmask 130048   ;;  %vm1765_vm3 = vcmask 392192   ;;  %s3777_s2 = inlined_call_operand.vmem [shape: bf16[64,32], index: 2, kind: input, shape index: {}]   ;;  %s3778_s3 = inlined_call_operand.vmem [shape: f32[1,32], index: 3, kind: input, shape index: {}]   ;;  %s3779_s0 = inlined_call_operand.vmem [shape: f32[256,64], index: 0, kind: input, shape index: {}]   ;;  %s3780_s4 = inlined_call_operand.vmem [shape: bf16[32,32], index: 4, kind: input, shape index: {}]   ;;  %s3781_s5 = inlined_call_operand.vmem [shape: f32[1,32], index: 5, kind: input, shape index: {}]   ;;  %s3782_s1 = inlined_call_operand.vmem [shape: f32[256,16], index: 1, kind: input, shape index: {}]   ;;  %s3783_s6 = inlined_call_operand.vmem [shape: bf16[16,32], index: 6, kind: input, shape index: {}]   ;;  %s3784_s7 = inlined_call_operand.vmem [shape: f32[1,32], index: 7, kind: input, shape index: {}]   ;;  %s3785_s8 = inlined_call_operand.vmem [shape: bf16[32,128], index: 8, kind: input, shape index: {}]   ;;  %s3786_s9 = inlined_call_operand.vmem [shape: f32[1,128], index: 9, kind: input, shape index: {}]   ;;  %s3787_s10 = inlined_call_operand.vmem [shape: bf16[256,128], index: 10, kind: output, shape index: {0}]   ;;  %s3788_s11 = inlined_call_operand.vmem [shape: bf16[256,128], index: 11, kind: output, shape index: {1}]  }
   0x1   :  { %v1973_v0 = vld [vmem:[%s3777_s2 + $0x18] sm:$0xff]  ;;  %v1972_v1 = vld [vmem:[%s3777_s2 + $0x10] sm:$0xff]  ;;  %v1971_v2 = vld [vmem:[%s3777_s2 + $0x8] sm:$0xff] }
   0x2   :  { %175 = vmatpush.bf16.msra.mxu0 %v1973_v0  ;;  %v1970_v3 = vld [vmem:[%s3777_s2] sm:$0xff]  ;;  %v39_v5 = vld [vmem:[%s3779_s0 + $0x8] sm:$0xff]  ;;  %v40_v7 = vld [vmem:[%s3779_s0 + $0x10] sm:$0xff]  ;;  %s2467_s2 = smov 112  }
   0x3   :  { %v38_v4 = vld [vmem:[%s3779_s0] sm:$0xff]  ;;  %v41_v8 = vld [vmem:[%s3779_s0 + $0x18] sm:$0xff]  ;;  %v43_v11 = vld [vmem:[%s3779_s0 + $0x28] sm:$0xff] }
   0x4   :  { %v70_v6 = vpack.c.bf16 %v39_v5, %v38_v4  ;;  %v71_v9 = vpack.c.bf16 %v41_v8, %v40_v7  ;;  %v42_v10 = vld [vmem:[%s3779_s0 + $0x20] sm:$0xff]  ;;  %v44_v13 = vld [vmem:[%s3779_s0 + $0x30] sm:$0xff]  ;;  %v45_v14 = vld [vmem:[%s3779_s0 + $0x38] sm:$0xff] }
   0x5   :  { %v72_v12 = vpack.c.bf16 %v43_v11, %v42_v10  ;;  %v73_v15 = vpack.c.bf16 %v45_v14, %v44_v13  ;;  %v46_v16 = vld [vmem:[%s3779_s0 + $0x40] sm:$0xff]  ;;  %v47_v17 = vld [vmem:[%s3779_s0 + $0x48] sm:$0xff]  ;;  %v48_v19 = vld [vmem:[%s3779_s0 + $0x50] sm:$0xff] }
   0x6   :  { %176 = vmatpush.bf16.msra.mxu0 %v1972_v1  ;;  %v74_v18 = vpack.c.bf16 %v47_v17, %v46_v16  ;;  %v49_v20 = vld [vmem:[%s3779_s0 + $0x58] sm:$0xff]  ;;  %v1975_v22 = vld [vmem:[%s3780_s4 + $0x8] sm:$0xff]  ;;  %v1974_v23 = vld [vmem:[%s3780_s4] sm:$0xff] }
   0x7   :  { %v75_v21 = vpack.c.bf16 %v49_v20, %v48_v19  ;;  %383 = vmatpush.bf16.msra.mxu1 %v1975_v22  ;;  %v50_v24 = vld [vmem:[%s3779_s0 + $0x60] sm:$0xff]  ;;  %v51_v25 = vld [vmem:[%s3779_s0 + $0x68] sm:$0xff]  ;;  %v564_v38 = vld [vmem:[%s3782_s1 + $0x10] sm:$0xff] }
   0x8   :  { %v76_v26 = vpack.c.bf16 %v51_v25, %v50_v24  ;;  %v2598_v28 = vld [vmem:[%s3778_s3] ss:$0 sm:$0xff]  ;;  %v563_v35 = vld [vmem:[%s3782_s1 + $0x8] sm:$0xff]  ;;  %630 = vrot.lane.b32.xlu1 %v564_v38, %s2466_s20  ;;  %v52_v40 = vld [vmem:[%s3779_s0 + $0x70] sm:$0xff] }
   0x9   :  { %v562_v29 = vld [vmem:[%s3782_s1] sm:$0xff]  ;;  %v53_v41 = vld [vmem:[%s3779_s0 + $0x78] sm:$0xff]  ;;  %v567_v52 = vld [vmem:[%s3782_s1 + $0x28] sm:$0xff] }
   0xa   :  { %177 = vmatpush.bf16.msra.mxu0 %v1971_v2  ;;  %626 = vrot.lane.b32.xlu0 %v562_v29, %s2466_s20  ;;  %v77_v42 = vpack.c.bf16 %v53_v41, %v52_v40  ;;  %v565_v47 = vld [vmem:[%s3782_s1 + $0x18] sm:$0xff]  ;;  %v566_v49 = vld [vmem:[%s3782_s1 + $0x20] sm:$0xff]  ;;  %v568_v58 = vld [vmem:[%s3782_s1 + $0x30] sm:$0xff] }
   0xb   :  { %384 = vmatpush.bf16.msra.mxu1 %v1974_v23  ;;  %634 = vrot.lane.b32.xlu2 %v566_v49, %s2466_s20  ;;  %v54_v59 = vld [vmem:[%s3779_s0 + $0x80] sm:$0xff]  ;;  %v55_v60 = vld [vmem:[%s3779_s0 + $0x88] sm:$0xff]  ;;  %v56_v10 = vld [vmem:[%s3779_s0 + $0x90] sm:$0xff] }
   0xc   :  { %v78_v61 = vpack.c.bf16 %v55_v60, %v54_v59  ;;  %v57_v11 = vld [vmem:[%s3779_s0 + $0x98] sm:$0xff]  ;;  %v58_v23 = vld [vmem:[%s3779_s0 + $0xa0] sm:$0xff]  ;;  %v59_v24 = vld [vmem:[%s3779_s0 + $0xa8] sm:$0xff] }
   0xd   :  { %v79_v13 = vpack.c.bf16 %v57_v11, %v56_v10  ;;  %v569_v60 = vld [vmem:[%s3782_s1 + $0x38] sm:$0xff] }
   0xe   :  { %178 = vmatpush.bf16.msra.mxu0 %v1970_v3 }
  0x10   :  { %632 = vrot.lane.b32.xlu1 %v565_v47, %s2466_s20  ;;  %v61_v47 = vld [vmem:[%s3779_s0 + $0xb8] sm:$0xff] }
  0x11   :  { %1886 = vmatmul.msk.bf16.vlgmr.msra.gmra.mxu0 %vm122_vm0, %v70_v6 }
  0x12   :  { %628 = vrot.lane.b32.xlu0 %v563_v35, %s2466_s20 }
  0x13   :  { %636 = vrot.lane.b32.xlu2 %v567_v52, %s2466_s20 }
  0x1b   :  { %638 = vrot.lane.b32.xlu2 %v568_v58, %s2466_s20 }
  0x21   :  { %1887 = vmatmul.msk.bf16.gmra.mxu0 %vm122_vm0, %v71_v9 }
  0x31   :  { %1888 = vmatmul.msk.bf16.gmra.mxu0 %vm122_vm0, %v72_v12 }
  0x41   :  { %1889 = vmatmul.msk.bf16.gmra.mxu0 %vm122_vm0, %v73_v15 }
  0x51   :  { %1890 = vmatmul.msk.bf16.gmra.mxu0 %vm122_vm0, %v74_v18 }
  0x61   :  { %1891 = vmatmul.msk.bf16.gmra.mxu0 %vm122_vm0, %v75_v21 }
  0x71   :  { %1892 = vmatmul.msk.bf16.gmra.mxu0 %vm122_vm0, %v76_v26  ;;  %v80_v26 = vpack.c.bf16 %v59_v24, %v58_v23 }
  0x7c   :  { %v627_v40 = vpop.permute.xlu0 %626 }
  0x81   :  { %1893 = vmatmul.msk.bf16.gmra.mxu0 %vm122_vm0, %v77_v42 }
  0x8e   :  { %v180_v27 = vpop.f32.mrf.mxu0 }
  0x8f   :  { %v181_v30 = vadd.f32 %v2598_v28, %v180_v27 }
  0x91   :  { %v260_v33 = vmax.f32 %v181_v30, 0.0  ;;  %1894 = vmatmul.msk.bf16.gmra.mxu0 %vm122_vm0, %v78_v61 }
  0x96   :  { %v182_v31 = vpop.f32.mrf.mxu0 }
  0x97   :  { %v183_v32 = vadd.f32 %v2598_v28, %v182_v31 }
  0x99   :  { %v261_v34 = vmax.f32 %v183_v32, 0.0 }
  0x9b   :  { %v292_v36 = vpack.c.bf16 %v261_v34, %v260_v33  ;;  %v2680_v33 = vld [vmem:[%s3781_s5] ss:$0 sm:$0xff] }
  0x9d   :  { %1910 = vmatmul.msk.bf16.vlgmr.msra.gmra.mxu1 %vm328_vm1, %v292_v36 }
  0x9e   :  { %v185_v37 = vpop.f32.mrf.mxu0 }
  0x9f   :  { %v186_v39 = vadd.f32 %v2598_v28, %v185_v37 }
  0xa1   :  { %v262_v44 = vmax.f32 %v186_v39, 0.0  ;;  %1895 = vmatmul.msk.bf16.gmra.mxu0 %vm122_vm0, %v79_v13 }
  0xa6   :  { %v187_v43 = vpop.f32.mrf.mxu0 }
  0xa7   :  { %v188_v45 = vadd.f32 %v2598_v28, %v187_v43 }
  0xa9   :  { %v263_v46 = vmax.f32 %v188_v45, 0.0 }
  0xab   :  { %v293_v48 = vpack.c.bf16 %v263_v46, %v262_v44  ;;  %v60_v46 = vld [vmem:[%s3779_s0 + $0xb0] sm:$0xff] }
  0xac   :  { %v81_v49 = vpack.c.bf16 %v61_v47, %v60_v46 }
  0xad   :  { %1911 = vmatmul.msk.bf16.gmra.mxu1 %vm328_vm1, %v293_v48 }
  0xae   :  { %v190_v50 = vpop.f32.mrf.mxu0 }
  0xaf   :  { %v191_v51 = vadd.f32 %v2598_v28, %v190_v50 }
  0xb1   :  { %v264_v54 = vmax.f32 %v191_v51, 0.0  ;;  %1896 = vmatmul.msk.bf16.gmra.mxu0 %vm122_vm0, %v80_v26  ;;  %v63_v26 = vld [vmem:[%s3779_s0 + $0xc8] sm:$0xff] }
  0xb6   :  { %v192_v53 = vpop.f32.mrf.mxu0 }
  0xb7   :  { %v193_v55 = vadd.f32 %v2598_v28, %v192_v53 }
  0xb9   :  { %v265_v56 = vmax.f32 %v193_v55, 0.0 }
  0xbb   :  { %v294_v57 = vpack.c.bf16 %v265_v56, %v264_v54  ;;  %v629_v56 = vpop.permute.xlu0 %628 }
  0xbd   :  { %1912 = vmatmul.msk.bf16.gmra.mxu1 %vm328_vm1, %v294_v57 }
  0xbe   :  { %v195_v62 = vpop.f32.mrf.mxu0 }
  0xbf   :  { %v196_v63 = vadd.f32 %v2598_v28, %v195_v62 }
  0xc1   :  { %v266_v1 = vmax.f32 %v196_v63, 0.0  ;;  %1897 = vmatmul.msk.bf16.gmra.mxu0 %vm122_vm0, %v81_v49  ;;  %v574_v49 = vld [vmem:[%s3782_s1 + $0x60] sm:$0xff] }
  0xc6   :  { %v197_v0 = vpop.f32.mrf.mxu0 }
  0xc7   :  { %v198_v2 = vadd.f32 %v2598_v28, %v197_v0 }
  0xc9   :  { %v267_v3 = vmax.f32 %v198_v2, 0.0  ;;  %v631_v2 = vpop.permute.xlu1 %630 }
  0xcb   :  { %v295_v4 = vpack.c.bf16 %v267_v3, %v266_v1 }
  0xcd   :  { %1913 = vmatmul.msk.bf16.gmra.mxu1 %vm328_vm1, %v295_v4 }
  0xce   :  { %v200_v5 = vpop.f32.mrf.mxu0 }
  0xcf   :  { %v201_v6 = vadd.f32 %v2598_v28, %v200_v5 }
  0xd1   :  { %v268_v8 = vmax.f32 %v201_v6, 0.0  ;;  %v570_v6 = vld [vmem:[%s3782_s1 + $0x40] sm:$0xff]  ;;  %v633_v11 = vpop.permute.xlu1 %632 }
  0xd6   :  { %v202_v7 = vpop.f32.mrf.mxu0 }
  0xd7   :  { %v203_v9 = vadd.f32 %v2598_v28, %v202_v7 }
  0xd9   :  { %v269_v12 = vmax.f32 %v203_v9, 0.0 }
  0xdb   :  { %v296_v14 = vpack.c.bf16 %v269_v12, %v268_v8 }
  0xdd   :  { %1914 = vmatmul.msk.bf16.gmra.mxu1 %vm328_vm1, %v296_v14  ;;  %v571_v14 = vld [vmem:[%s3782_s1 + $0x48] sm:$0xff] }
  0xde   :  { %v205_v15 = vpop.f32.mrf.mxu0 }
  0xdf   :  { %v206_v16 = vadd.f32 %v2598_v28, %v205_v15 }
  0xe1   :  { %v270_v18 = vmax.f32 %v206_v16, 0.0  ;;  %v635_v16 = vpop.permute.xlu2 %634 }
  0xe6   :  { %v207_v17 = vpop.f32.mrf.mxu0 }
  0xe7   :  { %v208_v19 = vadd.f32 %v2598_v28, %v207_v17 }
  0xe9   :  { %v271_v20 = vmax.f32 %v208_v19, 0.0 }
  0xeb   :  { %v297_v21 = vpack.c.bf16 %v271_v20, %v270_v18 }
  0xed   :  { %1915 = vmatmul.msk.bf16.gmra.mxu1 %vm328_vm1, %v297_v21 }
  0xee   :  { %v210_v22 = vpop.f32.mrf.mxu0 }
  0xef   :  { %v211_v25 = vadd.f32 %v2598_v28, %v210_v22  ;;  %v572_v22 = vld [vmem:[%s3782_s1 + $0x50] sm:$0xff] }
  0xf1   :  { %v272_v29 = vmax.f32 %v211_v25, 0.0  ;;  %v62_v25 = vld [vmem:[%s3779_s0 + $0xc0] sm:$0xff] }
  0xf6   :  { %v212_v27 = vpop.f32.mrf.mxu0 }
  0xf7   :  { %v213_v30 = vadd.f32 %v2598_v28, %v212_v27 }
  0xf9   :  { %v273_v31 = vmax.f32 %v213_v30, 0.0  ;;  %v637_v30 = vpop.permute.xlu2 %636 }
  0xfb   :  { %v298_v32 = vpack.c.bf16 %v273_v31, %v272_v29  ;;  %v82_v31 = vpack.c.bf16 %v63_v26, %v62_v25 }
  0xfd   :  { %1916 = vmatmul.msk.bf16.gmra.mxu1 %vm328_vm1, %v298_v32  ;;  %1898 = vmatmul.msk.bf16.gmra.mxu0 %vm122_vm0, %v82_v31  ;;  %v66_v31 = vld [vmem:[%s3779_s0 + $0xe0] sm:$0xff] }
  0xfe   :  { %v215_v41 = vpop.f32.mrf.mxu0 }
  0xff   :  { %v216_v48 = vadd.f32 %v2598_v28, %v215_v41 }
 0x101   :  { %v274_v53 = vmax.f32 %v216_v48, 0.0 }
 0x106   :  { %v217_v52 = vpop.f32.mrf.mxu0 }
 0x107   :  { %v218_v54 = vadd.f32 %v2598_v28, %v217_v52 }
 0x109   :  { %v275_v57 = vmax.f32 %v218_v54, 0.0 }
 0x10b   :  { %v299_v62 = vpack.c.bf16 %v275_v57, %v274_v53  ;;  %v575_v57 = vld [vmem:[%s3782_s1 + $0x68] sm:$0xff] }
 0x10d   :  { %1917 = vmatmul.msk.bf16.gmra.mxu1 %vm328_vm1, %v299_v62 }
 0x10e   :  { %v220_v27 = vpop.f32.mrf.mxu0 }
 0x116   :  { %v222_v41 = vpop.f32.mrf.mxu0 }
 0x11a   :  { %v386_v34 = vpop.f32.mrf.mxu1 }
 0x11b   :  { %v2683_v35 = vadd.f32 %v2680_v33, %v386_v34 }
 0x11d   :  { %v466_v36 = vmul.f32 0.5, %v2683_v35 }
 0x11e   :  { %v225_v53 = vpop.f32.mrf.mxu0 }
 0x11f   :  { %v498_v37 = vmul.f32 1.442695, %v466_v36 }
 0x121   :  { %2335 = vpow2.f32 %v498_v37  ;;  %v573_v37 = vld [vmem:[%s3782_s1 + $0x58] sm:$0xff] }
 0x122   :  { %v388_v38 = vpop.f32.mrf.mxu1 }
 0x123   :  { %v2687_v39 = vadd.f32 %v2680_v33, %v388_v38  ;;  %v221_v38 = vadd.f32 %v2598_v28, %v220_v27 }
 0x125   :  { %v467_v42 = vmul.f32 0.5, %v2687_v39 }
 0x126   :  { %v227_v62 = vpop.f32.mrf.mxu0 }
 0x127   :  { %v2690_v43 = vpop.eup %2335  ;;  %v500_v44 = vmul.f32 1.442695, %v467_v42  ;;  %v276_v42 = vmax.f32 %v221_v38, 0.0 }
 0x128   :  { %v722_v45 = vmul.f32 %v2690_v43, %v627_v40 }
 0x129   :  { %2337 = vpow2.f32 %v500_v44  ;;  %v223_v44 = vadd.f32 %v2598_v28, %v222_v41 }
 0x12a   :  { %v391_v50 = vpop.f32.mrf.mxu1  ;;  %786 = vrot.lane.b32.xlu0 %v722_v45, %s2467_s2  ;;  %v639_v45 = vpop.permute.xlu2 %638 }
 0x12b   :  { %v2702_v51 = vadd.f32 %v2680_v33, %v391_v50  ;;  %v277_v46 = vmax.f32 %v223_v44, 0.0 }
 0x12d   :  { %v468_v55 = vmul.f32 0.5, %v2702_v51  ;;  %v300_v50 = vpack.c.bf16 %v277_v46, %v276_v42 }
 0x12f   :  { %v2707_v58 = vpop.eup %2337  ;;  %v502_v59 = vmul.f32 1.442695, %v468_v55  ;;  %1918 = vmatmul.msk.bf16.gmra.mxu1 %vm328_vm1, %v300_v50  ;;  %v64_v55 = vld [vmem:[%s3779_s0 + $0xd0] sm:$0xff]  ;;  %v69_v50 = vld [vmem:[%s3779_s0 + $0xf8] sm:$0xff] }
 0x130   :  { %v723_v61 = vmul.f32 %v2707_v58, %v629_v56  ;;  %v65_v56 = vld [vmem:[%s3779_s0 + $0xd8] sm:$0xff] }
 0x131   :  { %2339 = vpow2.f32 %v502_v59  ;;  %v226_v59 = vadd.f32 %v2598_v28, %v225_v53 }
 0x132   :  { %v393_v0 = vpop.f32.mrf.mxu1  ;;  %788 = vrot.lane.b32.xlu1 %v723_v61, %s2467_s2  ;;  %640 = vrot.lane.b32.xlu0 %v569_v60, %s2466_s20  ;;  %v83_v60 = vpack.c.bf16 %v65_v56, %v64_v55 }
 0x133   :  { %v2718_v1 = vadd.f32 %v2680_v33, %v393_v0  ;;  %v278_v0 = vmax.f32 %v226_v59, 0.0 }
 0x134   :  { %1899 = vmatmul.msk.bf16.gmra.mxu0 %vm122_vm0, %v83_v60 }
 0x135   :  { %v469_v3 = vmul.f32 0.5, %v2718_v1 }
 0x137   :  { %v2722_v4 = vpop.eup %2339  ;;  %v504_v5 = vmul.f32 1.442695, %v469_v3 }
 0x138   :  { %3831 = vst [vmem:[#allocation2_spill] sm:$0xff] %v2722_v4  ;;  %v724_v7 = vmul.f32 %v2722_v4, %v631_v2  ;;  %v228_v2 = vadd.f32 %v2598_v28, %v227_v62 }
 0x139   :  { %2341 = vpow2.f32 %v504_v5 }
 0x13a   :  { %v396_v8 = vpop.f32.mrf.mxu1  ;;  %790 = vrot.lane.b32.xlu1 %v724_v7, %s2467_s2  ;;  %642 = vrot.lane.b32.xlu0 %v570_v6, %s2466_s20  ;;  %v279_v5 = vmax.f32 %v228_v2, 0.0 }
 0x13b   :  { %v2731_v9 = vadd.f32 %v2680_v33, %v396_v8  ;;  %v576_v8 = vld [vmem:[%s3782_s1 + $0x70] sm:$0xff] }
 0x13d   :  { %3832 = vst [vmem:[#allocation3_spill] sm:$0xff] %v2731_v9  ;;  %v470_v10 = vmul.f32 0.5, %v2731_v9 }
 0x13f   :  { %v2734_v12 = vpop.eup %2341  ;;  %v506_v13 = vmul.f32 1.442695, %v470_v10  ;;  %v301_v10 = vpack.c.bf16 %v279_v5, %v278_v0 }
 0x140   :  { %3833 = vst [vmem:[#allocation4_spill] sm:$0xff] %v2734_v12  ;;  %v725_v15 = vmul.f32 %v2734_v12, %v633_v11 }
 0x141   :  { %2343 = vpow2.f32 %v506_v13  ;;  %1919 = vmatmul.msk.bf16.gmra.mxu1 %vm328_vm1, %v301_v10 }
 0x142   :  { %v398_v17 = vpop.f32.mrf.mxu1  ;;  %792 = vrot.lane.b32.xlu2 %v725_v15, %s2467_s2  ;;  %644 = vrot.lane.b32.xlu1 %v571_v14, %s2466_s20 }
 0x143   :  { %v2743_v18 = vadd.f32 %v2680_v33, %v398_v17 }
 0x145   :  { %3834 = vst [vmem:[#allocation5_spill] sm:$0xff] %v2743_v18  ;;  %v471_v19 = vmul.f32 0.5, %v2743_v18 }
 0x147   :  { %v2746_v20 = vpop.eup %2343  ;;  %v508_v21 = vmul.f32 1.442695, %v471_v19 }
 0x148   :  { %v726_v23 = vmul.f32 %v2746_v20, %v635_v16 }
 0x149   :  { %2345 = vpow2.f32 %v508_v21 }
 0x14a   :  { %v401_v24 = vpop.f32.mrf.mxu1  ;;  %794 = vrot.lane.b32.xlu2 %v726_v23, %s2467_s2  ;;  %646 = vrot.lane.b32.xlu1 %v572_v22, %s2466_s20 }
 0x14b   :  { %v2761_v29 = vadd.f32 %v2680_v33, %v401_v24  ;;  %v230_v24 = vpop.f32.mrf.mxu0 }
 0x14c   :  { %v231_v27 = vadd.f32 %v2598_v28, %v230_v24 }
 0x14d   :  { %v472_v32 = vmul.f32 0.5, %v2761_v29 }
 0x14e   :  { %v280_v41 = vmax.f32 %v231_v27, 0.0 }
 0x14f   :  { %v2765_v34 = vpop.eup %2345  ;;  %v510_v36 = vmul.f32 1.442695, %v472_v32  ;;  %v67_v32 = vld [vmem:[%s3779_s0 + $0xe8] sm:$0xff] }
 0x150   :  { %v727_v40 = vmul.f32 %v2765_v34, %v637_v30  ;;  %v1976_v30 = vld [vmem:[%s3783_s6] sm:$0xff] }
 0x151   :  { %2347 = vpow2.f32 %v510_v36  ;;  %998 = vmatpush.bf16.msra.mxu2 %v1976_v30 }
 0x152   :  { %648 = vrot.lane.b32.xlu2 %v573_v37, %s2466_s20  ;;  %796 = vrot.lane.b32.xlu0 %v727_v40, %s2467_s2  ;;  %v403_v54 = vpop.f32.mrf.mxu1  ;;  %v84_v37 = vpack.c.bf16 %v67_v32, %v66_v31 }
 0x153   :  { %v2797_v61 = vadd.f32 %v2680_v33, %v403_v54  ;;  %v232_v38 = vpop.f32.mrf.mxu0 }
 0x154   :  { %v233_v42 = vadd.f32 %v2598_v28, %v232_v38  ;;  %1900 = vmatmul.msk.bf16.gmra.mxu0 %vm122_vm0, %v84_v37 }
 0x155   :  { %v473_v3 = vmul.f32 0.5, %v2797_v61 }
 0x156   :  { %v281_v44 = vmax.f32 %v233_v42, 0.0 }
 0x157   :  { %v2777_v48 = vpop.eup %2347  ;;  %v512_v11 = vmul.f32 1.442695, %v473_v3 }
 0x158   :  { %v728_v52 = vmul.f32 %v2777_v48, %v639_v45  ;;  %v302_v45 = vpack.c.bf16 %v281_v44, %v280_v41 }
 0x159   :  { %2349 = vpow2.f32 %v512_v11 }
 0x15a   :  { %650 = vrot.lane.b32.xlu2 %v574_v49, %s2466_s20  ;;  %798 = vrot.lane.b32.xlu0 %v728_v52, %s2467_s2  ;;  %v406_v6 = vpop.f32.mrf.mxu1  ;;  %v68_v49 = vld [vmem:[%s3779_s0 + $0xf0] sm:$0xff] }
 0x15b   :  { %v2811_v13 = vadd.f32 %v2680_v33, %v406_v6  ;;  %1920 = vmatmul.msk.bf16.gmra.mxu1 %vm328_vm1, %v302_v45  ;;  %v85_v52 = vpack.c.bf16 %v69_v50, %v68_v49 }
 0x15d   :  { %v474_v17 = vmul.f32 0.5, %v2811_v13 }
 0x15f   :  { %v2816_v16 = vpop.eup %2349  ;;  %v514_v22 = vmul.f32 1.442695, %v474_v17  ;;  %v235_v17 = vpop.f32.mrf.mxu0 }
 0x160   :  { %v236_v31 = vadd.f32 %v2598_v28, %v235_v17 }
 0x161   :  { %2351 = vpow2.f32 %v514_v22 }
 0x162   :  { %652 = vrot.lane.b32.xlu0 %v575_v57, %s2466_s20  ;;  %v408_v14 = vpop.f32.mrf.mxu1 }
 0x163   :  { %v2814_v15 = vadd.f32 %v2680_v33, %v408_v14 }
 0x164   :  { %1901 = vmatmul.msk.bf16.gmra.mxu0 %vm122_vm0, %v85_v52 }
 0x165   :  { %v475_v19 = vmul.f32 0.5, %v2814_v15 }
 0x167   :  { %v516_v23 = vmul.f32 1.442695, %v475_v19  ;;  %v2822_v25 = vpop.eup %2351  ;;  %v237_v38 = vpop.f32.mrf.mxu0 }
 0x168   :  { %3835 = vst [vmem:[#allocation6_spill] sm:$0xff] %v2822_v25  ;;  %v238_v41 = vadd.f32 %v2598_v28, %v237_v38 }
 0x169   :  { %2353 = vpow2.f32 %v516_v23 }
 0x16a   :  { %654 = vrot.lane.b32.xlu0 %v576_v8, %s2466_s20  ;;  %v411_v40 = vpop.f32.mrf.mxu1  ;;  %v283_v45 = vmax.f32 %v238_v41, 0.0 }
 0x16b   :  { %v2866_v11 = vadd.f32 %v2680_v33, %v411_v40  ;;  %v282_v40 = vmax.f32 %v236_v31, 0.0 }
 0x16d   :  { %3840 = vst [vmem:[#allocation11_spill] sm:$0xff] %v2866_v11  ;;  %v476_v22 = vmul.f32 0.5, %v2866_v11 }
 0x16f   :  { %v2824_v26 = vpop.eup %2353  ;;  %v518_v37 = vmul.f32 1.442695, %v476_v22 }
 0x170   :  { %3836 = vst [vmem:[#allocation7_spill] sm:$0xff] %v2824_v26 }
 0x172   :  { %v413_v46 = vpop.f32.mrf.mxu1 }
 0x173   :  { %v2848_v53 = vadd.f32 %v2680_v33, %v413_v46 }
 0x175   :  { %3837 = vst [vmem:[#allocation8_spill] sm:$0xff] %v2848_v53  ;;  %v477_v56 = vmul.f32 0.5, %v2848_v53 }
 0x177   :  { %v520_v59 = vmul.f32 1.442695, %v477_v56  ;;  %v577_v56 = vld [vmem:[%s3782_s1 + $0x78] sm:$0xff] }
 0x179   :  { %2355 = vpow2.f32 %v520_v59 }
 0x17a   :  { %v416_v57 = vpop.f32.mrf.mxu1 }
 0x17b   :  { %v2853_v60 = vadd.f32 %v2680_v33, %v416_v57  ;;  %v303_v57 = vpack.c.bf16 %v283_v45, %v282_v40  ;;  %v580_v45 = vld [vmem:[%s3782_s1 + $0x90] sm:$0xff] }
 0x17d   :  { %v478_v2 = vmul.f32 0.5, %v2853_v60  ;;  %1921 = vmatmul.msk.bf16.gmra.mxu1 %vm328_vm1, %v303_v57 }
 0x17f   :  { %v522_v14 = vmul.f32 1.442695, %v478_v2  ;;  %v2870_v19 = vpop.eup %2355 }
 0x181   :  { %2357 = vpow2.f32 %v522_v14 }
 0x182   :  { %2359 = vpow2.f32 %v518_v37 }
 0x187   :  { %v2879_v42 = vpop.eup %2357 }
 0x19c   :  { %v793_v54 = vpop.permute.xlu2 %792  ;;  %v787_v55 = vpop.permute.xlu0 %786 }
 0x19d   :  { %v2857_v3 = vadd.f32 %v787_v55, %v2683_v35  ;;  %v2885_v50 = vadd.f32 %v793_v54, %v2718_v1  ;;  %v2899_v54 = vpop.eup %2359 }
 0x19f   :  { %3838 = vst [vmem:[#allocation9_spill] sm:$0xff] %v2857_v3 }
 0x1a0   :  { %3842 = vst [vmem:[#allocation13_spill] sm:$0xff] %v2885_v50 }
 0x1a4   :  { %v795_v62 = vpop.permute.xlu2 %794  ;;  %v789_v0 = vpop.permute.xlu1 %788 }
 0x1a5   :  { %v2860_v5 = vadd.f32 %v789_v0, %v2687_v39  ;;  %v641_v6 = vpop.permute.xlu0 %640  ;;  %v418_v0 = vpop.f32.mrf.mxu1 }
 0x1a6   :  { %v729_v8 = vmul.f32 %v2816_v16, %v641_v6  ;;  %v581_v6 = vld [vmem:[%s3782_s1 + $0x98] sm:$0xff]  ;;  %v2912_v14 = vadd.f32 %v2680_v33, %v418_v0 }
 0x1a7   :  { %3839 = vst [vmem:[#allocation10_spill] sm:$0xff] %v2860_v5  ;;  %v914_v10 = vpack.c.bf16 %v2860_v5, %v2857_v3 }
 0x1a8   :  { %800 = vrot.lane.b32.xlu1 %v729_v8, %s2467_s2  ;;  %v479_v22 = vmul.f32 0.5, %v2912_v14 }
 0x1a9   :  { %1930 = vmatmul.msk.bf16.vlgmr.msra.gmra.mxu2 %vm942_vm2, %v914_v10  ;;  %v578_v10 = vld [vmem:[%s3782_s1 + $0x80] sm:$0xff] }
 0x1aa   :  { %v524_v37 = vmul.f32 1.442695, %v479_v22 }
 0x1ac   :  { %v649_v23 = vpop.permute.xlu2 %648  ;;  %v791_v24 = vpop.permute.xlu1 %790  ;;  %2361 = vpow2.f32 %v524_v37 }
 0x1ad   :  { %v733_v27 = vmul.f32 %v2870_v19, %v649_v23  ;;  %v643_v30 = vpop.permute.xlu0 %642  ;;  %v2882_v44 = vadd.f32 %v791_v24, %v2702_v51  ;;  %v579_v23 = vld [vmem:[%s3782_s1 + $0x88] sm:$0xff]  ;;  %v582_v24 = vld [vmem:[%s3782_s1 + $0xa0] sm:$0xff]  ;;  %v421_v31 = vpop.f32.mrf.mxu1 }
 0x1ae   :  { %v730_v32 = vmul.f32 %v2822_v25, %v643_v30  ;;  %v2932_v38 = vadd.f32 %v2680_v33, %v421_v31  ;;  %v583_v31 = vld [vmem:[%s3782_s1 + $0xa8] sm:$0xff] }
 0x1af   :  { %808 = vrot.lane.b32.xlu0 %v733_v27, %s2467_s2  ;;  %3841 = vst [vmem:[#allocation12_spill] sm:$0xff] %v2882_v44  ;;  %v915_v59 = vpack.c.bf16 %v2885_v50, %v2882_v44  ;;  %v2922_v27 = vadd.f32 %v795_v62, %v2731_v9 }
 0x1b0   :  { %802 = vrot.lane.b32.xlu1 %v730_v32, %s2467_s2  ;;  %v480_v41 = vmul.f32 0.5, %v2932_v38 }
 0x1b1   :  { %3843 = vst [vmem:[#allocation14_spill] sm:$0xff] %v2922_v27 }
 0x1b4   :  { %v651_v46 = vpop.permute.xlu2 %650  ;;  %v645_v49 = vpop.permute.xlu1 %644 }
 0x1b5   :  { %v734_v52 = vmul.f32 %v2879_v42, %v651_v46  ;;  %v731_v55 = vmul.f32 %v2824_v26, %v645_v49  ;;  %v240_v46 = vpop.f32.mrf.mxu0  ;;  %v526_v49 = vmul.f32 1.442695, %v480_v41 }
 0x1b7   :  { %804 = vrot.lane.b32.xlu2 %v731_v55, %s2467_s2  ;;  %810 = vrot.lane.b32.xlu0 %v734_v52, %s2467_s2  ;;  %v2944_v52 = vpop.eup %2361  ;;  %2363 = vpow2.f32 %v526_v49 }
 0x1b8   :  { %656 = vrot.lane.b32.xlu1 %v577_v56, %s2466_s20  ;;  %v241_v56 = vadd.f32 %v2598_v28, %v240_v46 }
 0x1b9   :  { %1931 = vmatmul.msk.bf16.gmra.mxu2 %vm942_vm2, %v915_v59 }
 0x1ba   :  { %v284_v0 = vmax.f32 %v241_v56, 0.0 }
 0x1bc   :  { %v647_v2 = vpop.permute.xlu1 %646 }
 0x1bd   :  { %v732_v8 = vmul.f32 %v2899_v54, %v647_v2  ;;  %v242_v59 = vpop.f32.mrf.mxu0 }
 0x1be   :  { %v243_v2 = vadd.f32 %v2598_v28, %v242_v59 }
 0x1bf   :  { %806 = vrot.lane.b32.xlu2 %v732_v8, %s2467_s2  ;;  %664 = vrot.lane.b32.xlu0 %v581_v6, %s2466_s20  ;;  %v2950_v6 = vpop.eup %2363 }
 0x1c0   :  { %658 = vrot.lane.b32.xlu1 %v578_v10, %s2466_s20  ;;  %3845 = vst [vmem:[#allocation16_spill] sm:$0xff] %v2950_v6  ;;  %v285_v8 = vmax.f32 %v243_v2, 0.0 }
 0x1c2   :  { %v304_v22 = vpack.c.bf16 %v285_v8, %v284_v0 }
 0x1c4   :  { %v797_v17 = vpop.permute.xlu0 %796  ;;  %1922 = vmatmul.msk.bf16.gmra.mxu1 %vm328_vm1, %v304_v22 }
 0x1c5   :  { %v2925_v30 = vadd.f32 %v797_v17, %v2743_v18  ;;  %v245_v49 = vpop.f32.mrf.mxu0 }
 0x1c6   :  { %v246_v2 = vadd.f32 %v2598_v28, %v245_v49 }
 0x1c7   :  { %3844 = vst [vmem:[#allocation15_spill] sm:$0xff] %v2925_v30  ;;  %v916_v32 = vpack.c.bf16 %v2925_v30, %v2922_v27  ;;  %660 = vrot.lane.b32.xlu2 %v579_v23, %s2466_s20  ;;  %666 = vrot.lane.b32.xlu0 %v582_v24, %s2466_s20  ;;  %v423_v24 = vpop.f32.mrf.mxu1 }
 0x1c9   :  { %1932 = vmatmul.msk.bf16.gmra.mxu2 %vm942_vm2, %v916_v32  ;;  %v2962_v32 = vadd.f32 %v2680_v33, %v423_v24  ;;  %v286_v24 = vmax.f32 %v246_v2, 0.0 }
 0x1cb   :  { %v481_v37 = vmul.f32 0.5, %v2962_v32 }
 0x1cc   :  { %v2937_v40 = vpop.permute.xlu0 %798 }
 0x1cd   :  { %v528_v46 = vmul.f32 1.442695, %v481_v37  ;;  %v247_v22 = vpop.f32.mrf.mxu0 }
 0x1cf   :  { %662 = vrot.lane.b32.xlu2 %v580_v45, %s2466_s20  ;;  %v426_v41 = vpop.f32.mrf.mxu1  ;;  %v584_v45 = vld [vmem:[%s3782_s1 + $0xb0] sm:$0xff]  ;;  %2365 = vpow2.f32 %v528_v46 }
 0x1d0   :  { %v2970_v56 = vadd.f32 %v2680_v33, %v426_v41 }
 0x1d2   :  { %3846 = vst [vmem:[#allocation17_spill] sm:$0xff] %v2970_v56  ;;  %v482_v0 = vmul.f32 0.5, %v2970_v56 }
 0x1d4   :  { %v653_v55 = vpop.permute.xlu0 %652 }
 0x1d5   :  { %v735_v57 = vmul.f32 %v2944_v52, %v653_v55  ;;  %v2975_v59 = vpop.eup %2365  ;;  %v250_v46 = vpop.f32.mrf.mxu0 }
 0x1d6   :  { %3848 = vst [vmem:[#allocation19_spill] sm:$0xff] %v2975_v59  ;;  %v251_v36 = vadd.f32 %v2598_v28, %v250_v46 }
 0x1d7   :  { %812 = vrot.lane.b32.xlu1 %v735_v57, %s2467_s2  ;;  %v428_v55 = vpop.f32.mrf.mxu1 }
 0x1d8   :  { %v2973_v57 = vadd.f32 %v2680_v33, %v428_v55 }
 0x1da   :  { %3847 = vst [vmem:[#allocation18_spill] sm:$0xff] %v2973_v57  ;;  %v483_v8 = vmul.f32 0.5, %v2973_v57 }
 0x1dc   :  { %v655_v17 = vpop.permute.xlu0 %654  ;;  %v532_v37 = vmul.f32 1.442695, %v483_v8 }
 0x1dd   :  { %v736_v23 = vmul.f32 %v2950_v6, %v655_v17  ;;  %v252_v17 = vpop.f32.mrf.mxu0 }
 0x1de   :  { %v253_v8 = vadd.f32 %v2598_v28, %v252_v17 }
 0x1df   :  { %814 = vrot.lane.b32.xlu1 %v736_v23, %s2467_s2  ;;  %v530_v23 = vmul.f32 1.442695, %v482_v0  ;;  %v431_v2 = vpop.f32.mrf.mxu1 }
 0x1e1   :  { %2367 = vpow2.f32 %v530_v23 }
 0x1e2   :  { %2369 = vpow2.f32 %v532_v37  ;;  %v1978_v37 = vld [vmem:[%s3785_s8 + $0x8] sm:$0xff] }
 0x1e3   :  { %1202 = vmatpush.bf16.msra.mxu3 %v1978_v37 }
 0x1e7   :  { %668 = vrot.lane.b32.xlu1 %v583_v31, %s2466_s20  ;;  %v248_v31 = vadd.f32 %v2598_v28, %v247_v22  ;;  %v2984_v55 = vpop.eup %2367  ;;  %v288_v22 = vmax.f32 %v251_v36, 0.0  ;;  %v1977_v36 = vld [vmem:[%s3785_s8] sm:$0xff]  ;;  %v433_v46 = vpop.f32.mrf.mxu1 }
 0x1e8   :  { %v2986_v49 = vpop.eup %2369  ;;  %1203 = vmatpush.bf16.msra.mxu3 %v1977_v36  ;;  %v3016_v0 = vadd.f32 %v2680_v33, %v433_v46 }
 0x1e9   :  { %v287_v41 = vmax.f32 %v248_v31, 0.0 }
 0x1ef   :  { %670 = vrot.lane.b32.xlu1 %v584_v45, %s2466_s20  ;;  %v305_v45 = vpack.c.bf16 %v287_v41, %v286_v24  ;;  %v289_v24 = vmax.f32 %v253_v8, 0.0  ;;  %v2996_v41 = vadd.f32 %v2680_v33, %v431_v2  ;;  %v436_v44 = vpop.f32.mrf.mxu1 }
 0x1f0   :  { %v3024_v50 = vadd.f32 %v2680_v33, %v436_v44 }
 0x1f1   :  { %1923 = vmatmul.msk.bf16.gmra.mxu1 %vm328_vm1, %v305_v45  ;;  %v306_v31 = vpack.c.bf16 %v289_v24, %v288_v22  ;;  %v255_v45 = vpop.f32.mrf.mxu0  ;;  %v484_v22 = vmul.f32 0.5, %v2996_v41  ;;  %v3007_v24 = vadd.f32 %v2937_v40, %v2761_v29 }
 0x1f3   :  { %3849 = vst [vmem:[#allocation20_spill] sm:$0xff] %v3007_v24  ;;  %v534_v47 = vmul.f32 1.442695, %v484_v22 }
 0x1f5   :  { %2371 = vpow2.f32 %v534_v47 }
 0x1f9   :  { %v257_v10 = vpop.f32.mrf.mxu0 }
 0x1fa   :  { %v258_v62 = vadd.f32 %v2598_v28, %v257_v10 }
 0x1fc   :  { %v291_v7 = vmax.f32 %v258_v62, 0.0 }
 0x201   :  { %1924 = vmatmul.msk.bf16.gmra.mxu1 %vm328_vm1, %v306_v31  ;;  %v256_v31 = vadd.f32 %v2598_v28, %v255_v45  ;;  %v3027_v28 = vpop.eup %2371 }
 0x203   :  { %v290_v36 = vmax.f32 %v256_v31, 0.0  ;;  %v486_v31 = vmul.f32 0.5, %v3024_v50 }
 0x205   :  { %v307_v22 = vpack.c.bf16 %v291_v7, %v290_v36 }
 0x211   :  { %v805_v23 = vpop.permute.xlu2 %804  ;;  %1925 = vmatmul.msk.bf16.gmra.mxu1 %vm328_vm1, %v307_v22  ;;  %v3047_v22 = vld [vmem:[%s3784_s7] ss:$0 sm:$0xff] }
 0x212   :  { %v3035_v36 = vadd.f32 %v805_v23, %v2814_v15 }
 0x214   :  { %3852 = vst [vmem:[#allocation23_spill] sm:$0xff] %v3035_v36 }
 0x219   :  { %v3002_v17 = vpop.permute.xlu2 %806 }
 0x21a   :  { %v801_v8 = vpop.permute.xlu1 %800 }
 0x21b   :  { %v3010_v2 = vadd.f32 %v801_v8, %v2797_v61  ;;  %v485_v8 = vmul.f32 0.5, %v3016_v0 }
 0x21d   :  { %3850 = vst [vmem:[#allocation21_spill] sm:$0xff] %v3010_v2  ;;  %v917_v37 = vpack.c.bf16 %v3010_v2, %v3007_v24  ;;  %v536_v46 = vmul.f32 1.442695, %v485_v8  ;;  %v538_v8 = vmul.f32 1.442695, %v486_v31 }
 0x21f   :  { %1933 = vmatmul.msk.bf16.gmra.mxu2 %vm942_vm2, %v917_v37  ;;  %2373 = vpow2.f32 %v536_v46  ;;  %v587_v46 = vld [vmem:[%s3782_s1 + $0xc8] sm:$0xff] }
 0x220   :  { %2375 = vpow2.f32 %v538_v8 }
 0x221   :  { %v661_v40 = vpop.permute.xlu2 %660  ;;  %v809_v21 = vpop.permute.xlu0 %808 }
 0x222   :  { %v739_v45 = vmul.f32 %v2986_v49, %v661_v40  ;;  %v803_v63 = vpop.permute.xlu1 %802  ;;  %v3063_v27 = vadd.f32 %v809_v21, %v2848_v53 }
 0x223   :  { %v3030_v47 = vadd.f32 %v803_v63, %v2811_v13 }
 0x224   :  { %820 = vrot.lane.b32.xlu0 %v739_v45, %s2467_s2  ;;  %3854 = vst [vmem:[#allocation25_spill] sm:$0xff] %v3063_v27 }
 0x225   :  { %3851 = vst [vmem:[#allocation22_spill] sm:$0xff] %v3030_v47  ;;  %v918_v63 = vpack.c.bf16 %v3035_v36, %v3030_v47  ;;  %v3042_v45 = vpop.eup %2373 }
 0x226   :  { %v3060_v8 = vpop.eup %2375 }
 0x227   :  { %3853 = vst [vmem:[#allocation24_spill] sm:$0xff] %v3060_v8 }
 0x229   :  { %v663_v62 = vpop.permute.xlu2 %662  ;;  %v811_v10 = vpop.permute.xlu0 %810 }
 0x22a   :  { %v740_v7 = vmul.f32 %v3027_v28, %v663_v62  ;;  %v657_v37 = vpop.permute.xlu1 %656 }
 0x22b   :  { %v737_v44 = vmul.f32 %v2975_v59, %v657_v37 }
 0x22c   :  { %822 = vrot.lane.b32.xlu0 %v740_v7, %s2467_s2  ;;  %v1000_v40 = vpop.f32.mrf.mxu2 }
 0x22d   :  { %816 = vrot.lane.b32.xlu2 %v737_v44, %s2467_s2  ;;  %v1001_v7 = vadd.f32 %v3047_v22, %v1000_v40 }
 0x22f   :  { %1934 = vmatmul.msk.bf16.gmra.mxu2 %vm942_vm2, %v918_v63  ;;  %v1080_v47 = vmax.f32 %v1001_v7, 0.0  ;;  %v586_v7 = vld [vmem:[%s3782_s1 + $0xc0] sm:$0xff] }
 0x231   :  { %v665_v23 = vpop.permute.xlu0 %664 }
 0x232   :  { %v659_v62 = vpop.permute.xlu1 %658  ;;  %v741_v31 = vmul.f32 %v3042_v45, %v665_v23 }
 0x233   :  { %v738_v37 = vmul.f32 %v2984_v55, %v659_v62 }
 0x234   :  { %676 = vrot.lane.b32.xlu0 %v587_v46, %s2466_s20  ;;  %v1002_v44 = vpop.f32.mrf.mxu2  ;;  %824 = vrot.lane.b32.xlu1 %v741_v31, %s2467_s2  ;;  %v588_v46 = vld [vmem:[%s3782_s1 + $0xd0] sm:$0xff]  ;;  %v585_v31 = vld [vmem:[%s3782_s1 + $0xb8] sm:$0xff] }
 0x235   :  { %v1003_v63 = vadd.f32 %v3047_v22, %v1002_v44  ;;  %818 = vrot.lane.b32.xlu2 %v738_v37, %s2467_s2  ;;  %v3074_v37 = vadd.f32 %v3002_v17, %v2866_v11  ;;  %v589_v17 = vld [vmem:[%s3782_s1 + $0xd8] sm:$0xff] }
 0x237   :  { %v1081_v36 = vmax.f32 %v1003_v63, 0.0  ;;  %3855 = vst [vmem:[#allocation26_spill] sm:$0xff] %v3074_v37 }
 0x239   :  { %v667_v23 = vpop.permute.xlu0 %666  ;;  %v1112_v40 = vpack.c.bf16 %v1081_v36, %v1080_v47  ;;  %v919_v47 = vpack.c.bf16 %v3063_v27, %v3074_v37  ;;  %v438_v36 = vpop.f32.mrf.mxu1 }
 0x23a   :  { %v742_v62 = vmul.f32 %v3060_v8, %v667_v23 }
 0x23b   :  { %1954 = vmatmul.msk.bf16.vlgmr.msra.gmra.mxu3 %vm328_vm1, %v1112_v40  ;;  %v3094_v40 = vadd.f32 %v2680_v33, %v438_v36 }
 0x23c   :  { %678 = vrot.lane.b32.xlu0 %v588_v46, %s2466_s20  ;;  %v1005_v21 = vpop.f32.mrf.mxu2  ;;  %826 = vrot.lane.b32.xlu1 %v742_v62, %s2467_s2 }
 0x23d   :  { %672 = vrot.lane.b32.xlu2 %v585_v31, %s2466_s20  ;;  %v1006_v44 = vadd.f32 %v3047_v22, %v1005_v21  ;;  %v487_v27 = vmul.f32 0.5, %v3094_v40  ;;  %v590_v21 = vld [vmem:[%s3782_s1 + $0xe0] sm:$0xff] }
 0x23f   :  { %1935 = vmatmul.msk.bf16.gmra.mxu2 %vm942_vm2, %v919_v47  ;;  %v1082_v46 = vmax.f32 %v1006_v44, 0.0 }
 0x241   :  { %v441_v36 = vpop.f32.mrf.mxu1 }
 0x244   :  { %v1007_v63 = vpop.f32.mrf.mxu2  ;;  %680 = vrot.lane.b32.xlu1 %v589_v17, %s2466_s20  ;;  %v3103_v17 = vadd.f32 %v811_v10, %v2853_v60 }
 0x245   :  { %v1008_v23 = vadd.f32 %v3047_v22, %v1007_v63  ;;  %674 = vrot.lane.b32.xlu2 %v586_v7, %s2466_s20 }
 0x246   :  { %3856 = vst [vmem:[#allocation27_spill] sm:$0xff] %v3103_v17 }
 0x247   :  { %v1083_v62 = vmax.f32 %v1008_v23, 0.0  ;;  %v540_v23 = vmul.f32 1.442695, %v487_v27 }
 0x249   :  { %v813_v47 = vpop.permute.xlu1 %812  ;;  %v1113_v37 = vpack.c.bf16 %v1083_v62, %v1082_v46  ;;  %v3113_v46 = vadd.f32 %v2680_v33, %v441_v36  ;;  %2377 = vpow2.f32 %v540_v23 }
 0x24a   :  { %v3106_v7 = vadd.f32 %v813_v47, %v2912_v14 }
 0x24b   :  { %1955 = vmatmul.msk.bf16.gmra.mxu3 %vm328_vm1, %v1113_v37  ;;  %v488_v62 = vmul.f32 0.5, %v3113_v46  ;;  %v443_v37 = vpop.f32.mrf.mxu1 }
 0x24c   :  { %3857 = vst [vmem:[#allocation28_spill] sm:$0xff] %v3106_v7  ;;  %v920_v44 = vpack.c.bf16 %v3106_v7, %v3103_v17  ;;  %v1010_v63 = vpop.f32.mrf.mxu2  ;;  %682 = vrot.lane.b32.xlu1 %v590_v21, %s2466_s20  ;;  %v3120_v7 = vadd.f32 %v2680_v33, %v443_v37 }
 0x24d   :  { %v1011_v47 = vadd.f32 %v3047_v22, %v1010_v63  ;;  %v542_v30 = vmul.f32 1.442695, %v488_v62 }
 0x24f   :  { %1936 = vmatmul.msk.bf16.gmra.mxu2 %vm942_vm2, %v920_v44  ;;  %v3122_v27 = vpop.eup %2377  ;;  %v1084_v21 = vmax.f32 %v1011_v47, 0.0  ;;  %v489_v44 = vmul.f32 0.5, %v3120_v7  ;;  %2379 = vpow2.f32 %v542_v30 }
 0x250   :  { %3858 = vst [vmem:[#allocation29_spill] sm:$0xff] %v3122_v27 }
 0x251   :  { %v815_v10 = vpop.permute.xlu1 %814 }
 0x253   :  { %v446_v47 = vpop.f32.mrf.mxu1 }
 0x254   :  { %v1012_v31 = vpop.f32.mrf.mxu2  ;;  %v3134_v30 = vadd.f32 %v2680_v33, %v446_v47 }
 0x255   :  { %v1013_v17 = vadd.f32 %v3047_v22, %v1012_v31  ;;  %v544_v31 = vmul.f32 1.442695, %v489_v44  ;;  %v3130_v62 = vpop.eup %2379 }
 0x257   :  { %v1085_v36 = vmax.f32 %v1013_v17, 0.0  ;;  %2381 = vpow2.f32 %v544_v31 }
 0x259   :  { %v669_v23 = vpop.permute.xlu1 %668  ;;  %v1114_v24 = vpack.c.bf16 %v1085_v36, %v1084_v21  ;;  %v490_v36 = vmul.f32 0.5, %v3134_v30 }
 0x25a   :  { %v743_v2 = vmul.f32 %v3122_v27, %v669_v23 }
 0x25b   :  { %1956 = vmatmul.msk.bf16.gmra.mxu3 %vm328_vm1, %v1114_v24  ;;  %v448_v44 = vpop.f32.mrf.mxu1  ;;  %v546_v23 = vmul.f32 1.442695, %v490_v36 }
 0x25c   :  { %828 = vrot.lane.b32.xlu2 %v743_v2, %s2467_s2  ;;  %v591_v2 = vld [vmem:[%s3782_s1 + $0xe8] sm:$0xff]  ;;  %v3146_v31 = vadd.f32 %v2680_v33, %v448_v44 }
 0x25d   :  { %v3137_v21 = vpop.eup %2381  ;;  %2383 = vpow2.f32 %v546_v23 }
 0x25e   :  { %v491_v47 = vmul.f32 0.5, %v3146_v31 }
 0x261   :  { %v671_v17 = vpop.permute.xlu1 %670 }
 0x262   :  { %v744_v37 = vmul.f32 %v3130_v62, %v671_v17  ;;  %v548_v17 = vmul.f32 1.442695, %v491_v47 }
 0x263   :  { %v3154_v63 = vpop.eup %2383 }
 0x264   :  { %830 = vrot.lane.b32.xlu2 %v744_v37, %s2467_s2  ;;  %v592_v37 = vld [vmem:[%s3782_s1 + $0xf0] sm:$0xff]  ;;  %2385 = vpow2.f32 %v548_v17  ;;  %3859 = vst [vmem:[#allocation30_spill] sm:$0xff] %v3154_v63 }
 0x26a   :  { %v3156_v24 = vpop.eup %2385 }
 0x26b   :  { %3860 = vst [vmem:[#allocation31_spill] sm:$0xff] %v3156_v24 }
 0x26c   :  { %684 = vrot.lane.b32.xlu2 %v591_v2, %s2466_s20  ;;  %v3161_v2 = vadd.f32 %v815_v10, %v2932_v38 }
 0x26e   :  { %3861 = vst [vmem:[#allocation32_spill] sm:$0xff] %v3161_v2 }
 0x274   :  { %686 = vrot.lane.b32.xlu2 %v592_v37, %s2466_s20  ;;  %v451_v37 = vpop.f32.mrf.mxu1 }
 0x27c   :  { %v453_v59 = vpop.f32.mrf.mxu1 }
 0x287   :  { %v817_v44 = vpop.permute.xlu2 %816 }
 0x288   :  { %v3164_v23 = vadd.f32 %v817_v44, %v2962_v32 }
 0x28a   :  { %3862 = vst [vmem:[#allocation33_spill] sm:$0xff] %v3164_v23  ;;  %v921_v47 = vpack.c.bf16 %v3164_v23, %v3161_v2 }
 0x28c   :  { %1937 = vmatmul.msk.bf16.gmra.mxu2 %vm942_vm2, %v921_v47  ;;  %v3180_v47 = vadd.f32 %v2680_v33, %v451_v37 }
 0x28f   :  { %v819_v17 = vpop.permute.xlu2 %818 }
 0x290   :  { %v3170_v27 = vadd.f32 %v819_v17, %v2970_v56  ;;  %v492_v17 = vmul.f32 0.5, %v3180_v47 }
 0x292   :  { %3863 = vst [vmem:[#allocation34_spill] sm:$0xff] %v3170_v27  ;;  %v550_v3 = vmul.f32 1.442695, %v492_v17  ;;  %v593_v17 = vld [vmem:[%s3782_s1 + $0xf8] sm:$0xff] }
 0x294   :  { %2387 = vpow2.f32 %v550_v3 }
 0x296   :  { %v821_v8 = vpop.permute.xlu0 %820 }
 0x297   :  { %v673_v6 = vpop.permute.xlu2 %672  ;;  %v3173_v36 = vadd.f32 %v821_v8, %v2973_v57 }
 0x298   :  { %v745_v10 = vmul.f32 %v3137_v21, %v673_v6 }
 0x299   :  { %3864 = vst [vmem:[#allocation35_spill] sm:$0xff] %v3173_v36  ;;  %v922_v44 = vpack.c.bf16 %v3173_v36, %v3170_v27  ;;  %v3187_v27 = vadd.f32 %v2680_v33, %v453_v59  ;;  %v456_v36 = vpop.f32.mrf.mxu1 }
 0x29a   :  { %832 = vrot.lane.b32.xlu0 %v745_v10, %s2467_s2  ;;  %v3207_v26 = vadd.f32 %v2680_v33, %v456_v36  ;;  %v3219_v36 = vld [vmem:[%s3781_s5] ss:$0 sm:$0xff] }
 0x29b   :  { %v493_v5 = vmul.f32 0.5, %v3187_v27 }
 0x29c   :  { %1938 = vmatmul.msk.bf16.gmra.mxu2 %vm942_vm2, %v922_v44  ;;  %3867 = vst [vmem:[#allocation38_spill] sm:$0xff] %v3207_v26 }
 0x29e   :  { %v823_v2 = vpop.permute.xlu0 %822 }
 0x29f   :  { %v675_v23 = vpop.permute.xlu2 %674  ;;  %v3191_v44 = vadd.f32 %v823_v2, %v2996_v41 }
 0x2a0   :  { %v746_v8 = vmul.f32 %v3154_v63, %v675_v23 }
 0x2a1   :  { %3865 = vst [vmem:[#allocation36_spill] sm:$0xff] %v3191_v44  ;;  %v458_v12 = vpop.f32.mrf.mxu1 }
 0x2a2   :  { %834 = vrot.lane.b32.xlu0 %v746_v8, %s2467_s2  ;;  %v1015_v6 = vpop.f32.mrf.mxu2  ;;  %v552_v8 = vmul.f32 1.442695, %v493_v5 }
 0x2a3   :  { %v1016_v59 = vadd.f32 %v3047_v22, %v1015_v6 }
 0x2a4   :  { %2389 = vpow2.f32 %v552_v8 }
 0x2a5   :  { %v1086_v4 = vmax.f32 %v1016_v59, 0.0  ;;  %v3222_v59 = vadd.f32 %v3219_v36, %v458_v12 }
 0x2a6   :  { %v825_v10 = vpop.permute.xlu1 %824  ;;  %v677_v37 = vpop.permute.xlu0 %676 }
 0x2a7   :  { %v3194_v25 = vadd.f32 %v825_v10, %v3016_v0  ;;  %v747_v23 = vmul.f32 %v3156_v24, %v677_v37  ;;  %v3209_v37 = vpop.eup %2387  ;;  %3868 = vst [vmem:[#allocation39_spill] sm:$0xff] %v3222_v59 }
 0x2a9   :  { %3866 = vst [vmem:[#allocation37_spill] sm:$0xff] %v3194_v25  ;;  %v923_v3 = vpack.c.bf16 %v3194_v25, %v3191_v44  ;;  %836 = vrot.lane.b32.xlu1 %v747_v23, %s2467_s2 }
 0x2aa   :  { %688 = vrot.lane.b32.xlu0 %v593_v17, %s2466_s20  ;;  %v1017_v2 = vpop.f32.mrf.mxu2  ;;  %v494_v17 = vmul.f32 0.5, %v3207_v26  ;;  %v3224_v8 = vpop.eup %2389 }
 0x2ab   :  { %v1018_v10 = vadd.f32 %v3047_v22, %v1017_v2  ;;  %v495_v2 = vmul.f32 0.5, %v3222_v59 }
 0x2ac   :  { %1939 = vmatmul.msk.bf16.gmra.mxu2 %vm942_vm2, %v923_v3  ;;  %v554_v3 = vmul.f32 1.442695, %v494_v17 }
 0x2ad   :  { %v1087_v6 = vmax.f32 %v1018_v10, 0.0  ;;  %v556_v26 = vmul.f32 1.442695, %v495_v2 }
 0x2ae   :  { %v827_v44 = vpop.permute.xlu1 %826  ;;  %v679_v25 = vpop.permute.xlu0 %678  ;;  %2391 = vpow2.f32 %v554_v3 }
 0x2af   :  { %v748_v5 = vmul.f32 %v3209_v37, %v679_v25  ;;  %v1115_v23 = vpack.c.bf16 %v1087_v6, %v1086_v4  ;;  %v3228_v10 = vadd.f32 %v827_v44, %v3024_v50  ;;  %2393 = vpow2.f32 %v556_v26 }
 0x2b1   :  { %1957 = vmatmul.msk.bf16.gmra.mxu3 %vm328_vm1, %v1115_v23  ;;  %838 = vrot.lane.b32.xlu1 %v748_v5, %s2467_s2  ;;  %3869 = vst [vmem:[#allocation40_spill] sm:$0xff] %v3228_v10  ;;  %v461_v23 = vpop.f32.mrf.mxu1 }
 0x2b2   :  { %v1020_v33 = vpop.f32.mrf.mxu2  ;;  %v3239_v59 = vadd.f32 %v3219_v36, %v461_v23 }
 0x2b3   :  { %v1021_v12 = vadd.f32 %v3047_v22, %v1020_v33  ;;  %v3248_v33 = vld [vmem:[%s3786_s9] ss:$0 sm:$0xff] }
 0x2b4   :  { %v3243_v3 = vpop.eup %2391  ;;  %v496_v23 = vmul.f32 0.5, %v3239_v59 }
 0x2b5   :  { %v3257_v56 = vpop.eup %2393 }
 0x2b6   :  { %v829_v25 = vpop.permute.xlu2 %828  ;;  %v681_v4 = vpop.permute.xlu1 %680 }
 0x2b7   :  { %v3231_v6 = vadd.f32 %v829_v25, %v3094_v40  ;;  %v749_v5 = vmul.f32 %v3224_v8, %v681_v4  ;;  %v1088_v25 = vmax.f32 %v1021_v12, 0.0  ;;  %v558_v12 = vmul.f32 1.442695, %v496_v23 }
 0x2b9   :  { %3870 = vst [vmem:[#allocation41_spill] sm:$0xff] %v3231_v6  ;;  %v924_v17 = vpack.c.bf16 %v3231_v6, %v3228_v10  ;;  %840 = vrot.lane.b32.xlu2 %v749_v5, %s2467_s2  ;;  %2395 = vpow2.f32 %v558_v12 }
 0x2ba   :  { %v1022_v57 = vpop.f32.mrf.mxu2 }
 0x2bb   :  { %v1023_v44 = vadd.f32 %v3047_v22, %v1022_v57 }
 0x2bc   :  { %1940 = vmatmul.msk.bf16.gmra.mxu2 %vm942_vm2, %v924_v17 }
 0x2bd   :  { %v1089_v4 = vmax.f32 %v1023_v44, 0.0 }
 0x2be   :  { %v1205_v5 = vpop.f32.mrf.mxu3  ;;  %v3250_v2 = vpop.permute.xlu2 %830 }
 0x2bf   :  { %v1116_v10 = vpack.c.bf16 %v1089_v4, %v1088_v25  ;;  %v683_v6 = vpop.permute.xlu1 %682  ;;  %v1206_v17 = vadd.f32 %v3248_v33, %v1205_v5  ;;  %v3264_v23 = vpop.eup %2395 }
 0x2c0   :  { %v750_v57 = vmul.f32 %v3243_v3, %v683_v6 }
 0x2c1   :  { %1958 = vmatmul.msk.bf16.gmra.mxu3 %vm328_vm1, %v1116_v10  ;;  %v1285_v26 = vmul.f32 1.442695, %v1206_v17 }
 0x2c2   :  { %v1025_v44 = vpop.f32.mrf.mxu2  ;;  %842 = vrot.lane.b32.xlu0 %v750_v57, %s2467_s2 }
 0x2c3   :  { %2397 = vpow2.f32 %v1285_v26  ;;  %v1026_v6 = vadd.f32 %v3047_v22, %v1025_v44 }
 0x2c5   :  { %v1090_v57 = vmax.f32 %v1026_v6, 0.0 }
 0x2c6   :  { %v1207_v53 = vpop.f32.mrf.mxu3  ;;  %v685_v11 = vpop.permute.xlu2 %684 }
 0x2c7   :  { %v1208_v18 = vadd.f32 %v3248_v33, %v1207_v53  ;;  %v751_v25 = vmul.f32 %v3257_v56, %v685_v11  ;;  %v2316_v53 = vpack.i.bf16 %v3224_v8, %v3209_v37 }
 0x2c9   :  { %v1287_v4 = vmul.f32 1.442695, %v1208_v18  ;;  %844 = vrot.lane.b32.xlu1 %v751_v25, %s2467_s2  ;;  %v2398_v11 = vpop.eup %2397  ;;  %v2171_v25 = vpack.i.bf16 %v2687_v39, %v2683_v35 }
 0x2ca   :  { %v1027_v10 = vpop.f32.mrf.mxu2  ;;  %v1349_v6 = vsel %vm122_vm0, %v1206_v17, %v2398_v11  ;;  %v2186_v17 = vpack.i.bf16 %v2797_v61, %v2761_v29  ;;  %v2191_v61 = vpack.i.bf16 %v2814_v15, %v2811_v13 }
 0x2cb   :  { %2399 = vpow2.f32 %v1287_v4  ;;  %v1028_v5 = vadd.f32 %v3047_v22, %v1027_v10 }
 0x2cd   :  { %v1091_v12 = vmax.f32 %v1028_v5, 0.0 }
 0x2ce   :  { %v1210_v9 = vpop.f32.mrf.mxu3  ;;  %v687_v63 = vpop.permute.xlu2 %686 }
 0x2cf   :  { %v1117_v26 = vpack.c.bf16 %v1091_v12, %v1090_v57  ;;  %v752_v44 = vmul.f32 %v3264_v23, %v687_v63  ;;  %v1211_v4 = vadd.f32 %v3248_v33, %v1210_v9  ;;  %v2176_v63 = vpack.i.bf16 %v2718_v1, %v2702_v51 }
 0x2d0   :  { %v2321_v51 = vpack.i.bf16 %v3257_v56, %v3243_v3 }
 0x2d1   :  { %v2400_v24 = vpop.eup %2399  ;;  %1959 = vmatmul.msk.bf16.gmra.mxu3 %vm328_vm1, %v1117_v26  ;;  %846 = vrot.lane.b32.xlu2 %v752_v44, %s2467_s2  ;;  %v1289_v35 = vmul.f32 1.442695, %v1211_v4 }
 0x2d2   :  { %v1350_v10 = vsel %vm122_vm0, %v1208_v18, %v2400_v24  ;;  %v1030_v5 = vpop.f32.mrf.mxu2  ;;  %2172 = vrot.lane.b32.xlu1 %v2171_v25, %s2466_s20 }
 0x2d3   :  { %v1982_v57 = vpack.c.bf16 %v1350_v10, %v1349_v6  ;;  %2401 = vpow2.f32 %v1289_v35  ;;  %v1031_v18 = vadd.f32 %v3047_v22, %v1030_v5  ;;  %v2201_v6 = vpack.i.bf16 %v2912_v14, %v2853_v60 }
 0x2d4   :  { %v2206_v14 = vpack.i.bf16 %v2962_v32, %v2932_v38 }
 0x2d5   :  { %1983 = vst [vmem:[%s3787_s10] sm:$0xff] %v1982_v57   ;;  %v1092_v26 = vmax.f32 %v1031_v18, 0.0  ;;  %v463_v18 = vpop.f32.mrf.mxu1 }
 0x2d6   :  { %v1212_v39 = vpop.f32.mrf.mxu3 }
 0x2d7   :  { %v1213_v9 = vadd.f32 %v3248_v33, %v1212_v39 }
 0x2d9   :  { %v1291_v24 = vmul.f32 1.442695, %v1213_v9  ;;  %2177 = vrot.lane.b32.xlu2 %v2176_v63, %s2466_s20  ;;  %v2402_v25 = vpop.eup %2401  ;;  %v2216_v63 = vpack.i.bf16 %v3016_v0, %v2996_v41  ;;  %v3320_v0 = vadd.f32 %v3219_v36, %v463_v18  ;;  %v3871_v36 = vpack.i.bf16 %v2707_v58, %v2690_v43 }
 0x2da   :  { %v1032_v12 = vpop.f32.mrf.mxu2  ;;  %2187 = vrot.lane.b32.xlu1 %v2186_v17, %s2466_s20  ;;  %v1351_v57 = vsel %vm122_vm0, %v1211_v4, %v2402_v25  ;;  %v2221_v17 = vpack.i.bf16 %v3094_v40, %v3024_v50  ;;  %v2236_v40 = vpack.i.bf16 %v3187_v27, %v3180_v47  ;;  %v3349_v43 = vadd.f32 %v3250_v2, %v3113_v46 }
 0x2db   :  { %2403 = vpow2.f32 %v1291_v24  ;;  %v1033_v11 = vadd.f32 %v3047_v22, %v1032_v12  ;;  %v2231_v24 = vpack.i.bf16 %v3146_v31, %v3134_v30  ;;  %v2246_v50 = vpack.i.bf16 %v3320_v0, %v3239_v59 }
 0x2dd   :  { %v1093_v44 = vmax.f32 %v1033_v11, 0.0  ;;  %v3872_v11 = vpack.i.bf16 %v2765_v34, %v2746_v20  ;;  %v497_v20 = vmul.f32 0.5, %v3320_v0 }
 0x2de   :  { %v1215_v1 = vpop.f32.mrf.mxu3 }
 0x2df   :  { %v1118_v29 = vpack.c.bf16 %v1093_v44, %v1092_v26  ;;  %v1216_v5 = vadd.f32 %v3248_v33, %v1215_v1  ;;  %v3873_v26 = vpack.i.bf16 %v2816_v16, %v2777_v48  ;;  %v3874_v44 = vpack.i.bf16 %v2870_v19, %v2899_v54 }
 0x2e0   :  { %v3875_v16 = vpack.i.bf16 %v2944_v52, %v2879_v42  ;;  %v560_v19 = vmul.f32 1.442695, %v497_v20  ;;  %v3876_v54 = vpack.i.bf16 %v2986_v49, %v2984_v55 }
 0x2e1   :  { %v2404_v10 = vpop.eup %2403  ;;  %1960 = vmatmul.msk.bf16.gmra.mxu3 %vm328_vm1, %v1118_v29  ;;  %2192 = vrot.lane.b32.xlu2 %v2191_v61, %s2466_s20  ;;  %v1293_v13 = vmul.f32 1.442695, %v1216_v5 }
 0x2e2   :  { %v1352_v35 = vsel %vm122_vm0, %v1213_v9, %v2404_v10  ;;  %2202 = vrot.lane.b32.xlu1 %v2201_v6, %s2466_s20  ;;  %v3877_v6 = vpack.i.bf16 %v3042_v45, %v3027_v28  ;;  %v3878_v10 = vpack.i.bf16 %v3137_v21, %v3130_v62  ;;  %v3879_v62 = vld [vmem:[#allocation31_spill] sm:$0xff] }
 0x2e3   :  { %v1987_v39 = vpack.c.bf16 %v1352_v35, %v1351_v57  ;;  %2405 = vpow2.f32 %v1293_v13 }
 0x2e5   :  { %2139 = vst [vmem:[%s3787_s10 + $0x8] sm:$0xff] %v1987_v39  }
 0x2e6   :  { %v1217_v15 = vpop.f32.mrf.mxu3 }
 0x2e7   :  { %v1218_v60 = vadd.f32 %v3248_v33, %v1217_v15  ;;  %v3882_v15 = vld [vmem:[#allocation3_spill] sm:$0xff] }
 0x2e9   :  { %v1295_v4 = vmul.f32 1.442695, %v1218_v60  ;;  %2207 = vrot.lane.b32.xlu2 %v2206_v14, %s2466_s20  ;;  %v2406_v9 = vpop.eup %2405 }
 0x2ea   :  { %2217 = vrot.lane.b32.xlu1 %v2216_v63, %s2466_s20  ;;  %v1353_v38 = vsel %vm122_vm0, %v1216_v5, %v2406_v9 }
 0x2eb   :  { %2407 = vpow2.f32 %v1295_v4 }
 0x2ec   :  { %2409 = vpow2.f32 %v560_v19 }
 0x2f1   :  { %v2408_v12 = vpop.eup %2407  ;;  %2222 = vrot.lane.b32.xlu2 %v2221_v17, %s2466_s20 }
 0x2f2   :  { %v1354_v32 = vsel %vm122_vm0, %v1218_v60, %v2408_v12  ;;  %2232 = vrot.lane.b32.xlu1 %v2231_v24, %s2466_s20  ;;  %v2410_v49 = vpop.eup %2409  ;;  %v3883_v60 = vld [vmem:[#allocation5_spill] sm:$0xff] }
 0x2f3   :  { %v1992_v41 = vpack.c.bf16 %v1354_v32, %v1353_v38  ;;  %v2181_v14 = vpack.i.bf16 %v3883_v60, %v3882_v15  ;;  %v2326_v9 = vpack.i.bf16 %v2410_v49, %v3264_v23  ;;  %v3884_v32 = vld [vmem:[#allocation11_spill] sm:$0xff] }
 0x2f5   :  { %2140 = vst [vmem:[%s3787_s10 + $0x10] sm:$0xff] %v1992_v41   ;;  %v3885_v41 = vld [vmem:[#allocation8_spill] sm:$0xff] }
 0x2f9   :  { %2237 = vrot.lane.b32.xlu2 %v2236_v40, %s2466_s20 }
 0x2fa   :  { %2247 = vrot.lane.b32.xlu1 %v2246_v50, %s2466_s20  ;;  %v2196_v50 = vpack.i.bf16 %v3885_v41, %v3884_v32 }
 0x301   :  { %2252 = vrot.lane.b32.xlu2 %v3871_v36, %s2466_s20 }
 0x302   :  { %2262 = vrot.lane.b32.xlu1 %v3872_v11, %s2466_s20  ;;  %v3886_v11 = vld [vmem:[#allocation17_spill] sm:$0xff] }
 0x309   :  { %2267 = vrot.lane.b32.xlu2 %v3873_v26, %s2466_s20  ;;  %v3887_v26 = vld [vmem:[#allocation18_spill] sm:$0xff] }
 0x30a   :  { %2277 = vrot.lane.b32.xlu1 %v3874_v44, %s2466_s20 }
 0x30c   :  { %v833_v1 = vpop.permute.xlu0 %832 }
 0x30d   :  { %v3352_v58 = vadd.f32 %v833_v1, %v3120_v7 }
 0x30f   :  { %v925_v34 = vpack.c.bf16 %v3352_v58, %v3349_v43  ;;  %v1035_v48 = vpop.f32.mrf.mxu2 }
 0x310   :  { %v1036_v25 = vadd.f32 %v3047_v22, %v1035_v48 }
 0x311   :  { %1941 = vmatmul.msk.bf16.gmra.mxu2 %vm942_vm2, %v925_v34  ;;  %2282 = vrot.lane.b32.xlu2 %v3875_v16, %s2466_s20 }
 0x312   :  { %2292 = vrot.lane.b32.xlu1 %v3876_v54, %s2466_s20  ;;  %v1094_v42 = vmax.f32 %v1036_v25, 0.0 }
 0x314   :  { %v835_v2 = vpop.permute.xlu0 %834 }
 0x315   :  { %v3377_v5 = vadd.f32 %v835_v2, %v3134_v30  ;;  %v3880_v30 = vld [vmem:[#allocation30_spill] sm:$0xff] }
 0x316   :  { %v3881_v21 = vpack.i.bf16 %v3879_v62, %v3880_v30 }
 0x317   :  { %v1037_v29 = vpop.f32.mrf.mxu2 }
 0x318   :  { %v1038_v61 = vadd.f32 %v3047_v22, %v1037_v29  ;;  %v3888_v29 = vld [vmem:[#allocation38_spill] sm:$0xff] }
 0x319   :  { %2297 = vrot.lane.b32.xlu2 %v3877_v6, %s2466_s20 }
 0x31a   :  { %v1095_v52 = vmax.f32 %v1038_v61, 0.0  ;;  %2307 = vrot.lane.b32.xlu1 %v3878_v10, %s2466_s20 }
 0x31b   :  { %v837_v55 = vpop.permute.xlu1 %836 }
 0x31c   :  { %v1119_v57 = vpack.c.bf16 %v1095_v52, %v1094_v42  ;;  %v3380_v35 = vadd.f32 %v837_v55, %v3146_v31  ;;  %v689_v39 = vpop.permute.xlu0 %688  ;;  %v841_v31 = vpop.permute.xlu2 %840  ;;  %v3889_v52 = vld [vmem:[#allocation39_spill] sm:$0xff] }
 0x31d   :  { %v753_v13 = vmul.f32 %v2410_v49, %v689_v39  ;;  %v3408_v38 = vadd.f32 %v841_v31, %v3187_v27  ;;  %v2211_v27 = vpack.i.bf16 %v3887_v26, %v3886_v11  ;;  %v2226_v49 = vpack.i.bf16 %v3120_v7, %v3113_v46 }
 0x31e   :  { %v926_v28 = vpack.c.bf16 %v3380_v35, %v3377_v5  ;;  %1961 = vmatmul.msk.bf16.gmra.mxu3 %vm328_vm1, %v1119_v57  ;;  %v2241_v7 = vpack.i.bf16 %v3889_v52, %v3888_v29 }
 0x31f   :  { %v1040_v45 = vpop.f32.mrf.mxu2  ;;  %848 = vrot.lane.b32.xlu0 %v753_v13, %s2467_s2 }
 0x320   :  { %v1041_v63 = vadd.f32 %v3047_v22, %v1040_v45 }
 0x321   :  { %1942 = vmatmul.msk.bf16.gmra.mxu2 %vm942_vm2, %v926_v28  ;;  %2312 = vrot.lane.b32.xlu2 %v3881_v21, %s2466_s20 }
 0x322   :  { %2322 = vrot.lane.b32.xlu1 %v2321_v51, %s2466_s20  ;;  %v1096_v24 = vmax.f32 %v1041_v63, 0.0 }
 0x323   :  { %v839_v17 = vpop.permute.xlu1 %838 }
 0x324   :  { %v3403_v56 = vadd.f32 %v839_v17, %v3180_v47 }
 0x326   :  { %v927_v23 = vpack.c.bf16 %v3408_v38, %v3403_v56 }
 0x327   :  { %v1042_v4 = vpop.f32.mrf.mxu2  ;;  %2182 = vrot.lane.b32.xlu0 %v2181_v14, %s2466_s20 }
 0x328   :  { %v1043_v18 = vadd.f32 %v3047_v22, %v1042_v4 }
 0x329   :  { %2327 = vrot.lane.b32.xlu2 %v2326_v9, %s2466_s20 }
 0x32a   :  { %v1097_v12 = vmax.f32 %v1043_v18, 0.0 }
 0x32b   :  { %v3405_v3 = vpop.permute.xlu2 %846 }
 0x32c   :  { %v1120_v51 = vpack.c.bf16 %v1097_v12, %v1096_v24 }
 0x32e   :  { %1962 = vmatmul.msk.bf16.gmra.mxu3 %vm328_vm1, %v1120_v51 }
 0x32f   :  { %v1045_v40 = vpop.f32.mrf.mxu2  ;;  %2197 = vrot.lane.b32.xlu0 %v2196_v50, %s2466_s20  ;;  %v3891_v50 = vld [vmem:[#allocation2_spill] sm:$0xff] }
 0x330   :  { %v1046_v44 = vadd.f32 %v3047_v22, %v1045_v40 }
 0x331   :  { %1943 = vmatmul.msk.bf16.gmra.mxu2 %vm942_vm2, %v927_v23 }
 0x332   :  { %v1098_v16 = vmax.f32 %v1046_v44, 0.0 }
 0x333   :  { %v3417_v47 = vpop.permute.xlu2 %2177 }
 0x334   :  { %v1220_v36 = vpop.f32.mrf.mxu3  ;;  %v843_v48 = vpop.permute.xlu0 %842 }
 0x335   :  { %v1221_v1 = vadd.f32 %v3248_v33, %v1220_v36  ;;  %v3428_v61 = vadd.f32 %v843_v48, %v3888_v29  ;;  %v3893_v48 = vld [vmem:[#allocation7_spill] sm:$0xff] }
 0x337   :  { %v1047_v20 = vpop.f32.mrf.mxu2  ;;  %2212 = vrot.lane.b32.xlu0 %v2211_v27, %s2466_s20  ;;  %v1297_v54 = vmul.f32 1.442695, %v1221_v1 }
 0x338   :  { %v1048_v34 = vadd.f32 %v3047_v22, %v1047_v20 }
 0x339   :  { %2411 = vpow2.f32 %v1297_v54 }
 0x33a   :  { %v1099_v19 = vmax.f32 %v1048_v34, 0.0 }
 0x33b   :  { %v3425_v2 = vpop.permute.xlu2 %2192  ;;  %v845_v25 = vpop.permute.xlu1 %844 }
 0x33c   :  { %v1121_v6 = vpack.c.bf16 %v1099_v19, %v1098_v16  ;;  %v1222_v42 = vpop.f32.mrf.mxu3  ;;  %v3431_v10 = vadd.f32 %v845_v25, %v3889_v52  ;;  %v3894_v16 = vld [vmem:[#allocation6_spill] sm:$0xff] }
 0x33d   :  { %v1223_v55 = vadd.f32 %v3248_v33, %v1222_v42  ;;  %v3895_v19 = vpack.i.bf16 %v3893_v48, %v3894_v16 }
 0x33e   :  { %v928_v57 = vpack.c.bf16 %v3431_v10, %v3428_v61  ;;  %1963 = vmatmul.msk.bf16.gmra.mxu3 %vm328_vm1, %v1121_v6 }
 0x33f   :  { %v1299_v39 = vmul.f32 1.442695, %v1223_v55  ;;  %v1050_v13 = vpop.f32.mrf.mxu2  ;;  %2227 = vrot.lane.b32.xlu0 %v2226_v49, %s2466_s20  ;;  %v2412_v62 = vpop.eup %2411 }
 0x340   :  { %v1051_v46 = vadd.f32 %v3047_v22, %v1050_v13  ;;  %v1355_v15 = vsel %vm122_vm0, %v1221_v1, %v2412_v62 }
 0x341   :  { %2413 = vpow2.f32 %v1299_v39  ;;  %1944 = vmatmul.msk.bf16.gmra.mxu2 %vm942_vm2, %v928_v57  ;;  %v3896_v39 = vld [vmem:[#allocation10_spill] sm:$0xff] }
 0x342   :  { %v1100_v4 = vmax.f32 %v1051_v46, 0.0 }
 0x343   :  { %v3441_v28 = vpop.permute.xlu2 %2207 }
 0x344   :  { %v1225_v45 = vpop.f32.mrf.mxu3  ;;  %v2173_v32 = vpop.permute.xlu1 %2172 }
 0x345   :  { %v1226_v21 = vadd.f32 %v3248_v33, %v1225_v45  ;;  %v2175_v6 = vunpack.i.h.bf16 %v2173_v32  ;;  %v3897_v45 = vld [vmem:[#allocation9_spill] sm:$0xff] }
 0x347   :  { %v2414_v30 = vpop.eup %2413  ;;  %v1052_v31 = vpop.f32.mrf.mxu2  ;;  %2242 = vrot.lane.b32.xlu0 %v2241_v7, %s2466_s20  ;;  %v1301_v17 = vmul.f32 1.442695, %v1226_v21  ;;  %v1702_v13 = vsel %vm942_vm2, %v3896_v39, %v2175_v6 }
 0x348   :  { %v1356_v60 = vsel %vm122_vm0, %v1223_v55, %v2414_v30  ;;  %v1053_v14 = vadd.f32 %v3047_v22, %v1052_v31  ;;  %v3890_v22 = vld [vmem:[#allocation4_spill] sm:$0xff] }
 0x349   :  { %v1997_v63 = vpack.c.bf16 %v1356_v60, %v1355_v15  ;;  %2415 = vpow2.f32 %v1301_v17  ;;  %v3892_v23 = vpack.i.bf16 %v3890_v22, %v3891_v50  ;;  %v3898_v60 = vld [vmem:[#allocation19_spill] sm:$0xff]  ;;  %v3901_v50 = vld [vmem:[#allocation21_spill] sm:$0xff] }
 0x34a   :  { %v1101_v9 = vmax.f32 %v1053_v14, 0.0  ;;  %v3899_v14 = vld [vmem:[#allocation16_spill] sm:$0xff] }
 0x34b   :  { %2141 = vst [vmem:[%s3787_s10 + $0x18] sm:$0xff] %v1997_v63   ;;  %v3454_v18 = vpop.permute.xlu2 %2222  ;;  %v3900_v63 = vpack.i.bf16 %v3898_v60, %v3899_v14 }
 0x34c   :  { %v1122_v24 = vpack.c.bf16 %v1101_v9, %v1100_v4  ;;  %v1227_v12 = vpop.f32.mrf.mxu3  ;;  %v2188_v29 = vpop.permute.xlu1 %2187 }
 0x34d   :  { %v1228_v51 = vadd.f32 %v3248_v33, %v1227_v12  ;;  %v2190_v9 = vunpack.i.h.bf16 %v2188_v29  ;;  %v2189_v17 = vunpack.i.l.bf16 %v2188_v29 }
 0x34e   :  { %1964 = vmatmul.msk.bf16.gmra.mxu3 %vm328_vm1, %v1122_v24 }
 0x34f   :  { %v1303_v41 = vmul.f32 1.442695, %v1228_v51  ;;  %2257 = vrot.lane.b32.xlu0 %v3892_v23, %s2466_s20  ;;  %v2416_v27 = vpop.eup %2415  ;;  %v1708_v23 = vsel %vm942_vm2, %v3901_v50, %v2190_v9 }
 0x350   :  { %v1357_v54 = vsel %vm122_vm0, %v1226_v21, %v2416_v27 }
 0x351   :  { %2417 = vpow2.f32 %v1303_v41 }
 0x353   :  { %v2238_v40 = vpop.permute.xlu2 %2237 }
 0x354   :  { %v1230_v36 = vpop.f32.mrf.mxu3  ;;  %v2240_v11 = vunpack.i.h.bf16 %v2238_v40  ;;  %v2239_v26 = vunpack.i.l.bf16 %v2238_v40  ;;  %v2203_v24 = vpop.permute.xlu1 %2202  ;;  %v3902_v40 = vld [vmem:[#allocation20_spill] sm:$0xff] }
 0x355   :  { %v1231_v34 = vadd.f32 %v3248_v33, %v1230_v36  ;;  %v1707_v36 = vsel %vm942_vm2, %v3902_v40, %v2189_v17 }
 0x356   :  { %v3464_v44 = vsel %vm942_vm2, %v3408_v38, %v2240_v11  ;;  %v3468_v1 = vsel %vm942_vm2, %v3403_v56, %v2239_v26  ;;  %v2174_v38 = vunpack.i.l.bf16 %v2173_v32 }
 0x357   :  { %v2418_v20 = vpop.eup %2417  ;;  %2272 = vrot.lane.b32.xlu0 %v3895_v19, %s2466_s20  ;;  %v1305_v56 = vmul.f32 1.442695, %v1231_v34  ;;  %v3903_v19 = vld [vmem:[#allocation29_spill] sm:$0xff] }
 0x358   :  { %v1358_v25 = vsel %vm122_vm0, %v1228_v51, %v2418_v20  ;;  %v1701_v62 = vsel %vm942_vm2, %v3897_v45, %v2174_v38  ;;  %v3906_v45 = vld [vmem:[#allocation28_spill] sm:$0xff] }
 0x359   :  { %v2002_v42 = vpack.c.bf16 %v1358_v25, %v1357_v54  ;;  %2419 = vpow2.f32 %v1305_v56  ;;  %v3904_v54 = vld [vmem:[#allocation24_spill] sm:$0xff]  ;;  %v2204_v56 = vunpack.i.l.bf16 %v2203_v24 }
 0x35a   :  { %v3905_v25 = vpack.i.bf16 %v3903_v19, %v3904_v54 }
 0x35b   :  { %2142 = vst [vmem:[%s3787_s10 + $0x20] sm:$0xff] %v2002_v42   ;;  %v2253_v52 = vpop.permute.xlu2 %2252  ;;  %v2205_v42 = vunpack.i.h.bf16 %v2203_v24 }
 0x35c   :  { %v1232_v55 = vpop.f32.mrf.mxu3  ;;  %v2255_v49 = vunpack.i.h.bf16 %v2253_v52  ;;  %v2254_v57 = vunpack.i.l.bf16 %v2253_v52 }
 0x35d   :  { %v1233_v7 = vadd.f32 %v3248_v33, %v1232_v55 }
 0x35e   :  { %v1733_v46 = vsel %vm328_vm1, %v1701_v62, %v2254_v57  ;;  %v1734_v30 = vsel %vm328_vm1, %v1702_v13, %v2255_v49  ;;  %v2218_v57 = vpop.permute.xlu1 %2217  ;;  %v1714_v62 = vsel %vm942_vm2, %v3906_v45, %v2205_v42 }
 0x35f   :  { %v1307_v21 = vmul.f32 1.442695, %v1233_v7  ;;  %v1766_v31 = vsel %vm1765_vm3, %v1733_v46, 0.0  ;;  %v1767_v15 = vsel %vm1765_vm3, %v1734_v30, 0.0  ;;  %2287 = vrot.lane.b32.xlu0 %v3900_v63, %s2466_s20  ;;  %v2420_v22 = vpop.eup %2419  ;;  %v2219_v9 = vunpack.i.l.bf16 %v2218_v57 }
 0x360   :  { %v2062_v4 = vpack.c.bf16 %v1767_v15, %v1766_v31  ;;  %v1359_v29 = vsel %vm122_vm0, %v1231_v34, %v2420_v22  ;;  %v3909_v22 = vld [vmem:[#allocation36_spill] sm:$0xff] }
 0x361   :  { %2421 = vpow2.f32 %v1307_v21  ;;  %v1719_v50 = vsel %vm942_vm2, %v3909_v22, %v2219_v9  ;;  %v3911_v22 = vld [vmem:[#allocation14_spill] sm:$0xff] }
 0x362   :  { %2063 = vst [vmem:[%s3788_s11] sm:$0xff] %v2062_v4   ;;  %v2220_v4 = vunpack.i.h.bf16 %v2218_v57 }
 0x363   :  { %v2268_v12 = vpop.permute.xlu2 %2267 }
 0x364   :  { %v1235_v51 = vpop.f32.mrf.mxu3  ;;  %v2270_v32 = vunpack.i.h.bf16 %v2268_v12  ;;  %v2269_v41 = vunpack.i.l.bf16 %v2268_v12 }
 0x365   :  { %v1236_v20 = vadd.f32 %v3248_v33, %v1235_v51 }
 0x366   :  { %v1739_v11 = vsel %vm328_vm1, %v1707_v36, %v2269_v41  ;;  %v1740_v26 = vsel %vm328_vm1, %v1708_v23, %v2270_v32  ;;  %v3908_v32 = vld [vmem:[#allocation37_spill] sm:$0xff]  ;;  %v2233_v37 = vpop.permute.xlu1 %2232 }
 0x367   :  { %v2422_v27 = vpop.eup %2421  ;;  %v1772_v48 = vsel %vm1765_vm3, %v1739_v11, 0.0  ;;  %v1773_v16 = vsel %vm1765_vm3, %v1740_v26, 0.0  ;;  %2302 = vrot.lane.b32.xlu0 %v3905_v25, %s2466_s20  ;;  %v1309_v55 = vmul.f32 1.442695, %v1236_v20  ;;  %v1720_v41 = vsel %vm942_vm2, %v3908_v32, %v2220_v4  ;;  %v3910_v32 = vld [vmem:[#allocation15_spill] sm:$0xff] }
 0x368   :  { %v1360_v6 = vsel %vm122_vm0, %v1233_v7, %v2422_v27  ;;  %v2077_v38 = vpack.c.bf16 %v1773_v16, %v1772_v48  ;;  %v3907_v7 = vld [vmem:[#allocation27_spill] sm:$0xff]  ;;  %v2235_v48 = vunpack.i.h.bf16 %v2233_v37  ;;  %v2234_v16 = vunpack.i.l.bf16 %v2233_v37 }
 0x369   :  { %v2007_v52 = vpack.c.bf16 %v1360_v6, %v1359_v29  ;;  %v1713_v46 = vsel %vm942_vm2, %v3907_v7, %v2204_v56  ;;  %2423 = vpow2.f32 %v1309_v55 }
 0x36a   :  { %2156 = vst [vmem:[%s3788_s11 + $0x18] sm:$0xff] %v2077_v38   ;;  %v1725_v6 = vsel %vm942_vm2, %v3377_v5, %v2234_v16  ;;  %v912_v5 = vadd.f32 %v3405_v3, %v3239_v59 }
 0x36b   :  { %2143 = vst [vmem:[%s3787_s10 + $0x28] sm:$0xff] %v2007_v52   ;;  %v2283_v49 = vpop.permute.xlu2 %2282 }
 0x36c   :  { %v1237_v39 = vpop.f32.mrf.mxu3  ;;  %v2285_v13 = vunpack.i.h.bf16 %v2283_v49  ;;  %v2284_v34 = vunpack.i.l.bf16 %v2283_v49 }
 0x36d   :  { %v1238_v30 = vadd.f32 %v3248_v33, %v1237_v39 }
 0x36e   :  { %v1745_v21 = vsel %vm328_vm1, %v1713_v46, %v2284_v34  ;;  %v1746_v31 = vsel %vm328_vm1, %v1714_v62, %v2285_v13  ;;  %v2248_v49 = vpop.permute.xlu1 %2247 }
 0x36f   :  { %v1311_v15 = vmul.f32 1.442695, %v1238_v30  ;;  %v1778_v60 = vsel %vm1765_vm3, %v1745_v21, 0.0  ;;  %v1779_v14 = vsel %vm1765_vm3, %v1746_v31, 0.0  ;;  %2317 = vrot.lane.b32.xlu0 %v2316_v53, %s2466_s20  ;;  %v2424_v51 = vpop.eup %2423  ;;  %v2249_v39 = vunpack.i.l.bf16 %v2248_v49 }
 0x370   :  { %v2092_v63 = vpack.c.bf16 %v1779_v14, %v1778_v60  ;;  %v1361_v11 = vsel %vm122_vm0, %v1236_v20, %v2424_v51  ;;  %v1726_v20 = vsel %vm942_vm2, %v3380_v35, %v2235_v48  ;;  %v2250_v45 = vunpack.i.h.bf16 %v2248_v49 }
 0x371   :  { %2425 = vpow2.f32 %v1311_v15  ;;  %v1731_v62 = vsel %vm942_vm2, %v912_v5, %v2249_v39 }
 0x372   :  { %2159 = vst [vmem:[%s3788_s11 + $0x30] sm:$0xff] %v2092_v63  }
 0x373   :  { %v2298_v17 = vpop.permute.xlu2 %2297 }
 0x374   :  { %v2300_v24 = vunpack.i.h.bf16 %v2298_v17  ;;  %v2299_v12 = vunpack.i.l.bf16 %v2298_v17 }
 0x376   :  { %v1751_v8 = vsel %vm328_vm1, %v1719_v50, %v2299_v12  ;;  %v1752_v53 = vsel %vm328_vm1, %v1720_v41, %v2300_v24  ;;  %v2263_v13 = vpop.permute.xlu1 %2262  ;;  %v3576_v12 = vld [vmem:[%s3784_s7] ss:$0 sm:$0xff] }
 0x377   :  { %v2426_v23 = vpop.eup %2425  ;;  %v1784_v40 = vsel %vm1765_vm3, %v1751_v8, 0.0  ;;  %v1785_v36 = vsel %vm1765_vm3, %v1752_v53, 0.0  ;;  %v2265_v17 = vunpack.i.h.bf16 %v2263_v13  ;;  %v2264_v24 = vunpack.i.l.bf16 %v2263_v13 }
 0x378   :  { %v1362_v26 = vsel %vm122_vm0, %v1238_v30, %v2426_v23  ;;  %v2107_v27 = vpack.c.bf16 %v1785_v36, %v1784_v40 }
 0x379   :  { %v2012_v19 = vpack.c.bf16 %v1362_v26, %v1361_v11 }
 0x37a   :  { %2162 = vst [vmem:[%s3788_s11 + $0x48] sm:$0xff] %v2107_v27  }
 0x37b   :  { %2144 = vst [vmem:[%s3787_s10 + $0x30] sm:$0xff] %v2012_v19   ;;  %v2313_v54 = vpop.permute.xlu2 %2312 }
 0x37c   :  { %v2315_v25 = vunpack.i.h.bf16 %v2313_v54  ;;  %v2314_v29 = vunpack.i.l.bf16 %v2313_v54 }
 0x37e   :  { %v1757_v38 = vsel %vm328_vm1, %v1725_v6, %v2314_v29  ;;  %v1758_v42 = vsel %vm328_vm1, %v1726_v20, %v2315_v25  ;;  %v2278_v63 = vpop.permute.xlu1 %2277 }
 0x37f   :  { %v1790_v56 = vsel %vm1765_vm3, %v1757_v38, 0.0  ;;  %v1791_v52 = vsel %vm1765_vm3, %v1758_v42, 0.0  ;;  %v2280_v29 = vunpack.i.h.bf16 %v2278_v63  ;;  %v2279_v20 = vunpack.i.l.bf16 %v2278_v63  ;;  %v3912_v42 = vld [vmem:[#allocation25_spill] sm:$0xff] }
 0x380   :  { %v2122_v55 = vpack.c.bf16 %v1791_v52, %v1790_v56  ;;  %v3913_v52 = vld [vmem:[#allocation26_spill] sm:$0xff] }
 0x382   :  { %2165 = vst [vmem:[%s3788_s11 + $0x60] sm:$0xff] %v2122_v55  }
 0x383   :  { %v2328_v57 = vpop.permute.xlu2 %2327 }
 0x384   :  { %v2329_v35 = vunpack.i.l.bf16 %v2328_v57  ;;  %v2330_v46 = vunpack.i.h.bf16 %v2328_v57 }
 0x386   :  { %v1763_v30 = vsel %vm328_vm1, %v1731_v62, %v2329_v35  ;;  %v2293_v6 = vpop.permute.xlu1 %2292 }
 0x387   :  { %v1796_v14 = vsel %vm1765_vm3, %v1763_v30, 0.0 }
 0x391   :  { %v849_v34 = vpop.permute.xlu0 %848 }
 0x392   :  { %v913_v7 = vadd.f32 %v849_v34, %v3320_v0 }
 0x394   :  { %v929_v21 = vpack.c.bf16 %v913_v7, %v912_v5  ;;  %v1732_v31 = vsel %vm942_vm2, %v913_v7, %v2250_v45  ;;  %v1055_v15 = vpop.f32.mrf.mxu2 }
 0x395   :  { %v1764_v60 = vsel %vm328_vm1, %v1732_v31, %v2330_v46  ;;  %v1056_v51 = vadd.f32 %v3576_v12, %v1055_v15  ;;  %v2294_v31 = vunpack.i.l.bf16 %v2293_v6 }
 0x396   :  { %v1797_v59 = vsel %vm1765_vm3, %v1764_v60, 0.0  ;;  %1945 = vmatmul.msk.bf16.gmra.mxu2 %vm942_vm2, %v929_v21  ;;  %v2295_v21 = vunpack.i.h.bf16 %v2293_v6 }
 0x397   :  { %v2137_v3 = vpack.c.bf16 %v1797_v59, %v1796_v14  ;;  %v1102_v11 = vmax.f32 %v1056_v51, 0.0  ;;  %v3914_v14 = vld [vmem:[#allocation35_spill] sm:$0xff] }
 0x399   :  { %2168 = vst [vmem:[%s3788_s11 + $0x78] sm:$0xff] %v2137_v3   ;;  %v2183_v0 = vpop.permute.xlu0 %2182  ;;  %v3915_v3 = vld [vmem:[#allocation34_spill] sm:$0xff] }
 0x39a   :  { %v2185_v4 = vunpack.i.h.bf16 %v2183_v0  ;;  %v2184_v9 = vunpack.i.l.bf16 %v2183_v0 }
 0x39c   :  { %v1706_v41 = vsel %vm942_vm2, %v3910_v32, %v2185_v4  ;;  %v1705_v50 = vsel %vm942_vm2, %v3911_v22, %v2184_v9  ;;  %v1057_v37 = vpop.f32.mrf.mxu2 }
 0x39d   :  { %v1738_v8 = vsel %vm328_vm1, %v1706_v41, %v2265_v17  ;;  %v1737_v53 = vsel %vm328_vm1, %v1705_v50, %v2264_v24  ;;  %v1058_v23 = vadd.f32 %v3576_v12, %v1057_v37  ;;  %v2308_v24 = vpop.permute.xlu1 %2307 }
 0x39e   :  { %v1771_v40 = vsel %vm1765_vm3, %v1738_v8, 0.0  ;;  %v1770_v36 = vsel %vm1765_vm3, %v1737_v53, 0.0 }
 0x39f   :  { %v2072_v26 = vpack.c.bf16 %v1771_v40, %v1770_v36  ;;  %v1103_v27 = vmax.f32 %v1058_v23, 0.0 }
 0x3a1   :  { %2155 = vst [vmem:[%s3788_s11 + $0x10] sm:$0xff] %v2072_v26   ;;  %v1123_v48 = vpack.c.bf16 %v1103_v27, %v1102_v11  ;;  %v1240_v16 = vpop.f32.mrf.mxu3  ;;  %v2198_v19 = vpop.permute.xlu0 %2197  ;;  %v2310_v11 = vunpack.i.h.bf16 %v2308_v24  ;;  %v2309_v26 = vunpack.i.l.bf16 %v2308_v24 }
 0x3a2   :  { %v2200_v54 = vunpack.i.h.bf16 %v2198_v19  ;;  %v2199_v25 = vunpack.i.l.bf16 %v2198_v19  ;;  %v1241_v38 = vadd.f32 %v3248_v33, %v1240_v16 }
 0x3a3   :  { %1965 = vmatmul.msk.bf16.gmra.mxu3 %vm328_vm1, %v1123_v48 }
 0x3a4   :  { %v1712_v56 = vsel %vm942_vm2, %v3912_v42, %v2200_v54  ;;  %v1711_v55 = vsel %vm942_vm2, %v3913_v52, %v2199_v25  ;;  %v1060_v49 = vpop.f32.mrf.mxu2  ;;  %v1313_v34 = vmul.f32 1.442695, %v1241_v38 }
 0x3a5   :  { %v1744_v57 = vsel %vm328_vm1, %v1712_v56, %v2280_v29  ;;  %v1743_v39 = vsel %vm328_vm1, %v1711_v55, %v2279_v20  ;;  %v1061_v15 = vadd.f32 %v3576_v12, %v1060_v49  ;;  %v2323_v49 = vpop.permute.xlu1 %2322 }
 0x3a6   :  { %v1777_v35 = vsel %vm1765_vm3, %v1744_v57, 0.0  ;;  %v1776_v5 = vsel %vm1765_vm3, %v1743_v39, 0.0  ;;  %2427 = vpow2.f32 %v1313_v34 }
 0x3a7   :  { %v2087_v13 = vpack.c.bf16 %v1777_v35, %v1776_v5  ;;  %v1104_v41 = vmax.f32 %v1061_v15, 0.0  ;;  %v2325_v5 = vunpack.i.h.bf16 %v2323_v49  ;;  %v2180_v15 = vunpack.i.h.bf16 %v3417_v47 }
 0x3a9   :  { %2158 = vst [vmem:[%s3788_s11 + $0x28] sm:$0xff] %v2087_v13   ;;  %v1242_v45 = vpop.f32.mrf.mxu3  ;;  %v2213_v62 = vpop.permute.xlu0 %2212  ;;  %v2324_v13 = vunpack.i.l.bf16 %v2323_v49 }
 0x3aa   :  { %v1243_v7 = vadd.f32 %v3248_v33, %v1242_v45  ;;  %v2215_v46 = vunpack.i.h.bf16 %v2213_v62  ;;  %v2214_v30 = vunpack.i.l.bf16 %v2213_v62 }
 0x3ac   :  { %v1315_v60 = vmul.f32 1.442695, %v1243_v7  ;;  %v1718_v59 = vsel %vm942_vm2, %v3914_v14, %v2215_v46  ;;  %v1717_v0 = vsel %vm942_vm2, %v3915_v3, %v2214_v30  ;;  %v1062_v63 = vpop.f32.mrf.mxu2  ;;  %v2428_v23 = vpop.eup %2427 }
 0x3ad   :  { %v1750_v4 = vsel %vm328_vm1, %v1718_v59, %v2295_v21  ;;  %v1749_v9 = vsel %vm328_vm1, %v1717_v0, %v2294_v31  ;;  %v1063_v17 = vadd.f32 %v3576_v12, %v1062_v63  ;;  %v1363_v25 = vsel %vm122_vm0, %v1241_v38, %v2428_v23 }
 0x3ae   :  { %2429 = vpow2.f32 %v1315_v60  ;;  %v1783_v51 = vsel %vm1765_vm3, %v1750_v4, 0.0  ;;  %v1782_v32 = vsel %vm1765_vm3, %v1749_v9, 0.0  ;;  %v2179_v59 = vunpack.i.l.bf16 %v3417_v47 }
 0x3af   :  { %v2102_v22 = vpack.c.bf16 %v1783_v51, %v1782_v32  ;;  %v1105_v50 = vmax.f32 %v1063_v17, 0.0  ;;  %v3916_v51 = vld [vmem:[#allocation13_spill] sm:$0xff] }
 0x3b0   :  { %v1704_v32 = vsel %vm942_vm2, %v3916_v51, %v2180_v15  ;;  %v3920_v15 = vld [vmem:[#allocation33_spill] sm:$0xff] }
 0x3b1   :  { %2161 = vst [vmem:[%s3788_s11 + $0x40] sm:$0xff] %v2102_v22   ;;  %v1124_v37 = vpack.c.bf16 %v1105_v50, %v1104_v41  ;;  %v1245_v8 = vpop.f32.mrf.mxu3  ;;  %v2228_v53 = vpop.permute.xlu0 %2227  ;;  %v3917_v41 = vld [vmem:[#allocation12_spill] sm:$0xff] }
 0x3b2   :  { %v2230_v40 = vunpack.i.h.bf16 %v2228_v53  ;;  %v2229_v36 = vunpack.i.l.bf16 %v2228_v53  ;;  %v1246_v48 = vadd.f32 %v3248_v33, %v1245_v8  ;;  %v1703_v22 = vsel %vm942_vm2, %v3917_v41, %v2179_v59 }
 0x3b3   :  { %1966 = vmatmul.msk.bf16.gmra.mxu3 %vm328_vm1, %v1124_v37  ;;  %v2224_v41 = vunpack.i.l.bf16 %v3454_v18 }
 0x3b4   :  { %v2430_v27 = vpop.eup %2429  ;;  %v1724_v16 = vsel %vm942_vm2, %v3352_v58, %v2230_v40  ;;  %v1723_v19 = vsel %vm942_vm2, %v3349_v43, %v2229_v36  ;;  %v1065_v54 = vpop.f32.mrf.mxu2  ;;  %v1317_v43 = vmul.f32 1.442695, %v1246_v48 }
 0x3b5   :  { %v1364_v29 = vsel %vm122_vm0, %v1243_v7, %v2430_v27  ;;  %v1756_v20 = vsel %vm328_vm1, %v1724_v16, %v2310_v11  ;;  %v1755_v6 = vsel %vm328_vm1, %v1723_v19, %v2309_v26  ;;  %v1066_v34 = vadd.f32 %v3576_v12, %v1065_v54 }
 0x3b6   :  { %v2017_v42 = vpack.c.bf16 %v1364_v29, %v1363_v25  ;;  %v1789_v56 = vsel %vm1765_vm3, %v1756_v20, 0.0  ;;  %v1788_v52 = vsel %vm1765_vm3, %v1755_v6, 0.0  ;;  %2431 = vpow2.f32 %v1317_v43 }
 0x3b7   :  { %v2117_v55 = vpack.c.bf16 %v1789_v56, %v1788_v52  ;;  %v2195_v16 = vunpack.i.h.bf16 %v3425_v2  ;;  %v2194_v19 = vunpack.i.l.bf16 %v3425_v2  ;;  %v3919_v52 = vld [vmem:[#allocation22_spill] sm:$0xff] }
 0x3b8   :  { %2145 = vst [vmem:[%s3787_s10 + $0x38] sm:$0xff] %v2017_v42   ;;  %v3918_v42 = vld [vmem:[#allocation23_spill] sm:$0xff] }
 0x3b9   :  { %2164 = vst [vmem:[%s3788_s11 + $0x58] sm:$0xff] %v2117_v55   ;;  %v1247_v58 = vpop.f32.mrf.mxu3  ;;  %v2243_v38 = vpop.permute.xlu0 %2242  ;;  %v1710_v56 = vsel %vm942_vm2, %v3918_v42, %v2195_v16  ;;  %v1709_v2 = vsel %vm942_vm2, %v3919_v52, %v2194_v19 }
 0x3ba   :  { %v1248_v57 = vadd.f32 %v3248_v33, %v1247_v58  ;;  %v2245_v39 = vunpack.i.h.bf16 %v2243_v38  ;;  %v2244_v35 = vunpack.i.l.bf16 %v2243_v38 }
 0x3bc   :  { %v1319_v45 = vmul.f32 1.442695, %v1248_v57  ;;  %v1730_v62 = vsel %vm942_vm2, %v3431_v10, %v2245_v39  ;;  %v1729_v7 = vsel %vm942_vm2, %v3428_v61, %v2244_v35  ;;  %v1067_v46 = vpop.f32.mrf.mxu2  ;;  %v1106_v10 = vmax.f32 %v1066_v34, 0.0  ;;  %v2432_v9 = vpop.eup %2431 }
 0x3bd   :  { %v1762_v30 = vsel %vm328_vm1, %v1730_v62, %v2325_v5  ;;  %v1761_v21 = vsel %vm328_vm1, %v1729_v7, %v2324_v13  ;;  %v1068_v31 = vadd.f32 %v3576_v12, %v1067_v46  ;;  %v1365_v23 = vsel %vm122_vm0, %v1246_v48, %v2432_v9 }
 0x3be   :  { %2433 = vpow2.f32 %v1319_v45  ;;  %v1795_v60 = vsel %vm1765_vm3, %v1762_v30, 0.0  ;;  %v1794_v14 = vsel %vm1765_vm3, %v1761_v21, 0.0  ;;  %v2210_v5 = vunpack.i.h.bf16 %v3441_v28 }
 0x3bf   :  { %v2132_v3 = vpack.c.bf16 %v1795_v60, %v1794_v14  ;;  %v1107_v0 = vmax.f32 %v1068_v31, 0.0  ;;  %v2209_v13 = vunpack.i.l.bf16 %v3441_v28  ;;  %v3921_v14 = vld [vmem:[#allocation32_spill] sm:$0xff] }
 0x3c0   :  { %v1716_v60 = vsel %vm942_vm2, %v3920_v15, %v2210_v5 }
 0x3c1   :  { %2167 = vst [vmem:[%s3788_s11 + $0x70] sm:$0xff] %v2132_v3   ;;  %v1125_v61 = vpack.c.bf16 %v1107_v0, %v1106_v10  ;;  %v1250_v63 = vpop.f32.mrf.mxu3  ;;  %v2258_v4 = vpop.permute.xlu0 %2257  ;;  %v1715_v59 = vsel %vm942_vm2, %v3921_v14, %v2209_v13  ;;  %v3696_v10 = vld [vmem:[%s3786_s9] ss:$0 sm:$0xff] }
 0x3c2   :  { %v2260_v17 = vunpack.i.h.bf16 %v2258_v4  ;;  %v2259_v24 = vunpack.i.l.bf16 %v2258_v4  ;;  %v1251_v50 = vadd.f32 %v3248_v33, %v1250_v63 }
 0x3c3   :  { %1967 = vmatmul.msk.bf16.gmra.mxu3 %vm328_vm1, %v1125_v61 }
 0x3c4   :  { %v2434_v47 = vpop.eup %2433  ;;  %v1736_v37 = vsel %vm328_vm1, %v1704_v32, %v2260_v17  ;;  %v1735_v8 = vsel %vm328_vm1, %v1703_v22, %v2259_v24  ;;  %v1070_v53 = vpop.f32.mrf.mxu2  ;;  %v1321_v54 = vmul.f32 1.442695, %v1251_v50  ;;  %v2225_v32 = vunpack.i.h.bf16 %v3454_v18 }
 0x3c5   :  { %v1366_v40 = vsel %vm122_vm0, %v1248_v57, %v2434_v47  ;;  %v1769_v36 = vsel %vm1765_vm3, %v1736_v37, 0.0  ;;  %v1768_v11 = vsel %vm1765_vm3, %v1735_v8, 0.0  ;;  %v1071_v55 = vadd.f32 %v3576_v12, %v1070_v53 }
 0x3c6   :  { %v2022_v26 = vpack.c.bf16 %v1366_v40, %v1365_v23  ;;  %v2067_v27 = vpack.c.bf16 %v1769_v36, %v1768_v11  ;;  %2435 = vpow2.f32 %v1321_v54  ;;  %v3922_v23 = vld [vmem:[#allocation41_spill] sm:$0xff]  ;;  %v3923_v36 = vld [vmem:[#allocation40_spill] sm:$0xff] }
 0x3c7   :  { %v1108_v34 = vmax.f32 %v1071_v55, 0.0  ;;  %v1722_v40 = vsel %vm942_vm2, %v3922_v23, %v2225_v32  ;;  %v1721_v18 = vsel %vm942_vm2, %v3923_v36, %v2224_v41 }
 0x3c8   :  { %2146 = vst [vmem:[%s3787_s10 + $0x40] sm:$0xff] %v2022_v26  }
 0x3c9   :  { %2154 = vst [vmem:[%s3788_s11 + $0x8] sm:$0xff] %v2067_v27   ;;  %v1252_v48 = vpop.f32.mrf.mxu3  ;;  %v2273_v25 = vpop.permute.xlu0 %2272 }
 0x3ca   :  { %v1253_v29 = vadd.f32 %v3248_v33, %v1252_v48  ;;  %v2275_v20 = vunpack.i.h.bf16 %v2273_v25  ;;  %v2274_v6 = vunpack.i.l.bf16 %v2273_v25 }
 0x3cc   :  { %v1323_v49 = vmul.f32 1.442695, %v1253_v29  ;;  %v1742_v43 = vsel %vm328_vm1, %v1710_v56, %v2275_v20  ;;  %v1741_v58 = vsel %vm328_vm1, %v1709_v2, %v2274_v6  ;;  %v1072_v38 = vpop.f32.mrf.mxu2  ;;  %v2436_v30 = vpop.eup %2435 }
 0x3cd   :  { %v1775_v57 = vsel %vm1765_vm3, %v1742_v43, 0.0  ;;  %v1774_v33 = vsel %vm1765_vm3, %v1741_v58, 0.0  ;;  %v1073_v39 = vadd.f32 %v3576_v12, %v1072_v38  ;;  %v1367_v63 = vsel %vm122_vm0, %v1251_v50, %v2436_v30 }
 0x3ce   :  { %2437 = vpow2.f32 %v1323_v49  ;;  %v2082_v35 = vpack.c.bf16 %v1775_v57, %v1774_v33 }
 0x3cf   :  { %v1109_v45 = vmax.f32 %v1073_v39, 0.0 }
 0x3d0   :  { %2157 = vst [vmem:[%s3788_s11 + $0x20] sm:$0xff] %v2082_v35  }
 0x3d1   :  { %v1126_v62 = vpack.c.bf16 %v1109_v45, %v1108_v34  ;;  %v1255_v7 = vpop.f32.mrf.mxu3  ;;  %v2288_v46 = vpop.permute.xlu0 %2287 }
 0x3d2   :  { %v2290_v21 = vunpack.i.h.bf16 %v2288_v46  ;;  %v2289_v31 = vunpack.i.l.bf16 %v2288_v46  ;;  %v1256_v3 = vadd.f32 %v3696_v10, %v1255_v7 }
 0x3d3   :  { %1968 = vmatmul.msk.bf16.gmra.mxu3 %vm328_vm1, %v1126_v62 }
 0x3d4   :  { %v2438_v28 = vpop.eup %2437  ;;  %v1748_v0 = vsel %vm328_vm1, %v1716_v60, %v2290_v21  ;;  %v1747_v61 = vsel %vm328_vm1, %v1715_v59, %v2289_v31  ;;  %v1325_v22 = vmul.f32 1.442695, %v1256_v3 }
 0x3d5   :  { %v1368_v4 = vsel %vm122_vm0, %v1253_v29, %v2438_v28  ;;  %v1781_v9 = vsel %vm1765_vm3, %v1748_v0, 0.0  ;;  %v1780_v17 = vsel %vm1765_vm3, %v1747_v61, 0.0 }
 0x3d6   :  { %v2027_v24 = vpack.c.bf16 %v1368_v4, %v1367_v63  ;;  %v2097_v51 = vpack.c.bf16 %v1781_v9, %v1780_v17  ;;  %2439 = vpow2.f32 %v1325_v22 }
 0x3d8   :  { %2147 = vst [vmem:[%s3787_s10 + $0x48] sm:$0xff] %v2027_v24  }
 0x3d9   :  { %2160 = vst [vmem:[%s3788_s11 + $0x38] sm:$0xff] %v2097_v51   ;;  %v1257_v47 = vpop.f32.mrf.mxu3  ;;  %v2303_v50 = vpop.permute.xlu0 %2302 }
 0x3da   :  { %v1258_v37 = vadd.f32 %v3696_v10, %v1257_v47  ;;  %v2305_v8 = vunpack.i.h.bf16 %v2303_v50  ;;  %v2304_v53 = vunpack.i.l.bf16 %v2303_v50 }
 0x3dc   :  { %v1327_v11 = vmul.f32 1.442695, %v1258_v37  ;;  %v1754_v26 = vsel %vm328_vm1, %v1722_v40, %v2305_v8  ;;  %v1753_v27 = vsel %vm328_vm1, %v1721_v18, %v2304_v53  ;;  %v2440_v25 = vpop.eup %2439 }
 0x3dd   :  { %v1787_v16 = vsel %vm1765_vm3, %v1754_v26, 0.0  ;;  %v1786_v19 = vsel %vm1765_vm3, %v1753_v27, 0.0  ;;  %v1369_v52 = vsel %vm122_vm0, %v1256_v3, %v2440_v25 }
 0x3de   :  { %2441 = vpow2.f32 %v1327_v11  ;;  %v2112_v54 = vpack.c.bf16 %v1787_v16, %v1786_v19 }
 0x3e0   :  { %2163 = vst [vmem:[%s3788_s11 + $0x50] sm:$0xff] %v2112_v54  }
 0x3e1   :  { %v2318_v48 = vpop.permute.xlu0 %2317 }
 0x3e2   :  { %v2320_v29 = vunpack.i.h.bf16 %v2318_v48  ;;  %v2319_v20 = vunpack.i.l.bf16 %v2318_v48 }
 0x3e4   :  { %v2442_v6 = vpop.eup %2441  ;;  %v1760_v42 = vsel %vm328_vm1, %v3464_v44, %v2320_v29  ;;  %v1759_v56 = vsel %vm328_vm1, %v3468_v1, %v2319_v20 }
 0x3e5   :  { %v1370_v2 = vsel %vm122_vm0, %v1258_v37, %v2442_v6  ;;  %v1793_v55 = vsel %vm1765_vm3, %v1760_v42, 0.0  ;;  %v1792_v49 = vsel %vm1765_vm3, %v1759_v56, 0.0 }
 0x3e6   :  { %v2032_v43 = vpack.c.bf16 %v1370_v2, %v1369_v52  ;;  %v2127_v58 = vpack.c.bf16 %v1793_v55, %v1792_v49 }
 0x3e8   :  { %2148 = vst [vmem:[%s3787_s10 + $0x50] sm:$0xff] %v2032_v43  }
 0x3e9   :  { %2166 = vst [vmem:[%s3788_s11 + $0x68] sm:$0xff] %v2127_v58  }
 0x419   :  { %v1075_v44 = vpop.f32.mrf.mxu2 }
 0x41a   :  { %v1076_v1 = vadd.f32 %v3576_v12, %v1075_v44 }
 0x41c   :  { %v1110_v33 = vmax.f32 %v1076_v1, 0.0 }
 0x421   :  { %v1077_v38 = vpop.f32.mrf.mxu2 }
 0x422   :  { %v1078_v57 = vadd.f32 %v3576_v12, %v1077_v38 }
 0x424   :  { %v1111_v39 = vmax.f32 %v1078_v57, 0.0 }
 0x426   :  { %v1127_v35 = vpack.c.bf16 %v1111_v39, %v1110_v33  ;;  %v1260_v5 = vpop.f32.mrf.mxu3 }
 0x427   :  { %v1261_v13 = vadd.f32 %v3696_v10, %v1260_v5 }
 0x428   :  { %1969 = vmatmul.msk.bf16.gmra.mxu3 %vm328_vm1, %v1127_v35 }
 0x429   :  { %v1329_v34 = vmul.f32 1.442695, %v1261_v13 }
 0x42b   :  { %2443 = vpow2.f32 %v1329_v34 }
 0x42e   :  { %v1262_v45 = vpop.f32.mrf.mxu3 }
 0x42f   :  { %v1263_v62 = vadd.f32 %v3696_v10, %v1262_v45 }
 0x431   :  { %v1331_v7 = vmul.f32 1.442695, %v1263_v62  ;;  %v2444_v30 = vpop.eup %2443 }
 0x432   :  { %v1371_v31 = vsel %vm122_vm0, %v1261_v13, %v2444_v30 }
 0x433   :  { %2445 = vpow2.f32 %v1331_v7 }
 0x436   :  { %v1265_v46 = vpop.f32.mrf.mxu3 }
 0x437   :  { %v1266_v12 = vadd.f32 %v3696_v10, %v1265_v46 }
 0x439   :  { %v2446_v21 = vpop.eup %2445  ;;  %v1333_v14 = vmul.f32 1.442695, %v1266_v12 }
 0x43a   :  { %v1372_v15 = vsel %vm122_vm0, %v1263_v62, %v2446_v21 }
 0x43b   :  { %v2037_v60 = vpack.c.bf16 %v1372_v15, %v1371_v31  ;;  %2447 = vpow2.f32 %v1333_v14 }
 0x43d   :  { %2149 = vst [vmem:[%s3787_s10 + $0x58] sm:$0xff] %v2037_v60  }
 0x43e   :  { %v1267_v59 = vpop.f32.mrf.mxu3 }
 0x43f   :  { %v1268_v28 = vadd.f32 %v3696_v10, %v1267_v59 }
 0x441   :  { %v1335_v3 = vmul.f32 1.442695, %v1268_v28  ;;  %v2448_v61 = vpop.eup %2447 }
 0x442   :  { %v1373_v9 = vsel %vm122_vm0, %v1266_v12, %v2448_v61 }
 0x443   :  { %2449 = vpow2.f32 %v1335_v3 }
 0x446   :  { %v1270_v0 = vpop.f32.mrf.mxu3 }
 0x447   :  { %v1271_v4 = vadd.f32 %v3696_v10, %v1270_v0 }
 0x449   :  { %v2450_v63 = vpop.eup %2449  ;;  %v1337_v51 = vmul.f32 1.442695, %v1271_v4 }
 0x44a   :  { %v1374_v17 = vsel %vm122_vm0, %v1268_v28, %v2450_v63 }
 0x44b   :  { %v2042_v24 = vpack.c.bf16 %v1374_v17, %v1373_v9  ;;  %2451 = vpow2.f32 %v1337_v51 }
 0x44d   :  { %2150 = vst [vmem:[%s3787_s10 + $0x60] sm:$0xff] %v2042_v24  }
 0x44e   :  { %v1272_v32 = vpop.f32.mrf.mxu3 }
 0x44f   :  { %v1273_v41 = vadd.f32 %v3696_v10, %v1272_v32 }
 0x451   :  { %v1339_v22 = vmul.f32 1.442695, %v1273_v41  ;;  %v2452_v50 = vpop.eup %2451 }
 0x452   :  { %v1375_v53 = vsel %vm122_vm0, %v1271_v4, %v2452_v50 }
 0x453   :  { %2453 = vpow2.f32 %v1339_v22 }
 0x456   :  { %v1275_v47 = vpop.f32.mrf.mxu3 }
 0x457   :  { %v1276_v8 = vadd.f32 %v3696_v10, %v1275_v47 }
 0x459   :  { %v2454_v37 = vpop.eup %2453  ;;  %v1341_v36 = vmul.f32 1.442695, %v1276_v8 }
 0x45a   :  { %v1376_v23 = vsel %vm122_vm0, %v1273_v41, %v2454_v37 }
 0x45b   :  { %v2047_v40 = vpack.c.bf16 %v1376_v23, %v1375_v53  ;;  %2455 = vpow2.f32 %v1341_v36 }
 0x45d   :  { %2151 = vst [vmem:[%s3787_s10 + $0x68] sm:$0xff] %v2047_v40  }
 0x45e   :  { %v1277_v18 = vpop.f32.mrf.mxu3 }
 0x45f   :  { %v1278_v11 = vadd.f32 %v3696_v10, %v1277_v18 }
 0x461   :  { %v1343_v26 = vmul.f32 1.442695, %v1278_v11  ;;  %v2456_v27 = vpop.eup %2455 }
 0x462   :  { %v1377_v19 = vsel %vm122_vm0, %v1276_v8, %v2456_v27 }
 0x463   :  { %2457 = vpow2.f32 %v1343_v26 }
 0x469   :  { %v2458_v16 = vpop.eup %2457 }
 0x46a   :  { %v1378_v54 = vsel %vm122_vm0, %v1278_v11, %v2458_v16 }
 0x46b   :  { %v2052_v48 = vpack.c.bf16 %v1378_v54, %v1377_v19 }
 0x46d   :  { %2152 = vst [vmem:[%s3787_s10 + $0x70] sm:$0xff] %v2052_v48  }
 0x4ab   :  { %v1280_v25 = vpop.f32.mrf.mxu3 }
 0x4ac   :  { %v1281_v29 = vadd.f32 %v3696_v10, %v1280_v25 }
 0x4ae   :  { %v1345_v20 = vmul.f32 1.442695, %v1281_v29 }
 0x4b0   :  { %2459 = vpow2.f32 %v1345_v20 }
 0x4b3   :  { %v1282_v6 = vpop.f32.mrf.mxu3 }
 0x4b4   :  { %v1283_v42 = vadd.f32 %v3696_v10, %v1282_v6 }
 0x4b6   :  { %v1347_v56 = vmul.f32 1.442695, %v1283_v42  ;;  %v2460_v52 = vpop.eup %2459 }
 0x4b7   :  { %v1379_v55 = vsel %vm122_vm0, %v1281_v29, %v2460_v52 }
 0x4b8   :  { %2461 = vpow2.f32 %v1347_v56 }
 0x4be   :  { %v2462_v2 = vpop.eup %2461 }
 0x4bf   :  { %v1380_v49 = vsel %vm122_vm0, %v1283_v42, %v2462_v2 }
 0x4c0   :  { %v2057_v43 = vpack.c.bf16 %v1380_v49, %v1379_v55 }
 0x4c2   :  { %2153 = vst [vmem:[%s3787_s10 + $0x78] sm:$0xff] %v2057_v43  }

</bundles_post_ra>
